<compile_context>
chip_gen: v7x
topology: tpu7x:2x2x1
jax: 0.10.0
libtpu: 0.0.40
codegen_flags: <defaults>
</compile_context>

<pallas_src>
import functools

import jax
import jax.numpy as jnp
import numpy as np
from jax.experimental import pallas as pl
from jax.experimental.pallas import tpu as pltpu

EPS = 1e-5  # PyTorch GroupNorm default eps


# ----------------------------------------------------------------------------
# The single fused kernel (one grid step == one batch element)
# ----------------------------------------------------------------------------
def _resnet_block_kernel(x_ref, t_ref, c_ref, wt_ref, w1_ref, w2_ref, pgrp_ref,
                         *rest, W, groups, lpad, has_res_conv):
    if has_res_conv:
        wres_ref, out_ref = rest
    else:
        (out_ref,) = rest

    Cout, HW = out_ref.shape[1], out_ref.shape[2]
    n = float(HW * (Cout // groups))      # elements per GroupNorm group

    # per-channel constant columns, one fused (Cout, 8) operand
    c = c_ref[...]
    b1, g1, be1 = c[:, 0:1], c[:, 1:2], c[:, 2:3]
    b2, g2, be2 = c[:, 3:4], c[:, 4:5], c[:, 5:6]
    bt, bres = c[:, 6:7], c[:, 7:8]

    pgrp = pgrp_ref[...]                  # (Cout, Cout) 0/1 same-group matrix

    # lane-wise validity masks for the W boundary of the 3x3 taps
    # (shared by both convs; the H boundary is absorbed by the zero halos)
    colw = jax.lax.broadcasted_iota(jnp.int32, (1, HW), 1) % W
    m_l = colw > 0                        # valid lanes for a dw == -1 tap
    m_r = colw < (W - 1)                  # valid lanes for a dw == +1 tap

    def conv3x3(src, w_ref, bias):
        """3x3 'SAME' conv of src (C, HW) f32 -> (Cout, HW) f32.

        The zero-padded image is a lane-aligned concat (each piece a multiple
        of 128 lanes -> pure vreg placement, no stitching); taps are bf16
        slices of that slab (lane rotates only).
        """
        C = src.shape[0]
        zpad = jnp.zeros((C, lpad), jnp.bfloat16)
        padv = jnp.concatenate([zpad, src.astype(jnp.bfloat16), zpad], axis=1)

        def tap(dh, dw):
            s = lpad + dh * W + dw                       # static lane offset
            v = padv[:, s:s + HW]                        # (C, HW) bf16
            if dw == -1:
                v = jnp.where(m_l, v, 0)
            elif dw == 1:
                v = jnp.where(m_r, v, 0)
            return v

        offs = [(dh, dw) for dh in (-1, 0, 1) for dw in (-1, 0, 1)]
        if C < 128:
            # tiny C (demo): one im2col matmul, K = 9*C, staged in bf16
            patches = jnp.concatenate([tap(dh, dw) for dh, dw in offs], axis=0)
            y = jnp.dot(w_ref[...], patches, preferred_element_type=jnp.float32)
        else:
            # production C: skip the (9C, HW) slab, accumulate 9 K=C matmuls
            y = jnp.zeros((Cout, HW), jnp.float32)
            for k, (dh, dw) in enumerate(offs):
                y += jnp.dot(w_ref[:, k * C:(k + 1) * C], tap(dh, dw),
                             preferred_element_type=jnp.float32)
        return y + bias

    def gn_silu(y, gamma, beta):
        """GroupNorm + affine + SiLU on (Cout, HW).

        Centered two-pass variance avoids the E[y^2]-mean^2 cancellation; the
        per-group mapping is one exact-0/1 (Cout,Cout) matmul per statistic.
        """
        s1 = jnp.sum(y, axis=1, keepdims=True)                         # (C, 1)
        mean_c = jnp.dot(pgrp, s1, preferred_element_type=jnp.float32) / n
        d = y - mean_c
        s2 = jnp.sum(d * d, axis=1, keepdims=True)                     # (C, 1)
        var_c = jnp.dot(pgrp, s2, preferred_element_type=jnp.float32) / n
        z = d * jax.lax.rsqrt(var_c + EPS)
        z = z * gamma + beta
        return z * jax.nn.sigmoid(z)                                   # SiLU

    x = x_ref[0]                                   # (Cin, HW) f32

    # ---- Block1: conv3x3 -> GroupNorm -> SiLU -------------------------------
    h = gn_silu(conv3x3(x, w1_ref, b1), g1, be1)

    # ---- time MLP: Linear(SiLU(t)), broadcast over HW as a (Cout,1) column --
    t = t_ref[0]                                   # (Tdim, 1) f32
    ts = (t * jax.nn.sigmoid(t)).astype(jnp.bfloat16)
    h = h + (jnp.dot(wt_ref[...], ts, preferred_element_type=jnp.float32) + bt)

    # ---- Block2 (h never leaves VMEM) ----------------------------------------
    h2 = gn_silu(conv3x3(h, w2_ref, b2), g2, be2)

    # ---- residual: 1x1 conv when dim != dim_out, plain f32 skip otherwise ----
    if has_res_conv:
        res = jnp.dot(wres_ref[...], x.astype(jnp.bfloat16),
                      preferred_element_type=jnp.float32) + bres
    else:
        res = x                                    # identity (Cin == Cout)

    out_ref[0] = h2 + res                          # lane-dense (Cout, HW) store


# ----------------------------------------------------------------------------
# Wrapper
# ----------------------------------------------------------------------------
def _group_same_matrix(C, G):
    cg = C // G
    gid = jnp.arange(C) // cg
    return (gid[:, None] == gid[None, :]).astype(jnp.float32)   # (C, C) 0/1


@functools.partial(jax.jit, static_argnames=("groups",))
def resnet_block_forward(x_nchw, time_emb, params, *, groups):
    """Matches ResnetBlock.forward(x, time_emb). x_nchw: (B, dim, H, W)."""
    B, Cin, H, W = x_nchw.shape
    HW = H * W
    Cout = params["w1"].shape[-1]
    Tdim = time_emb.shape[-1]
    has_res = "wres" in params
    bf16 = jnp.bfloat16
    LPAD = -(-(W + 1) // 128) * 128           # lane-aligned halo width (>= W+1)

    # NCHW consumed / produced directly: only contiguous trailing-dim reshapes,
    # no HBM transposes on the activations.
    x = x_nchw.reshape(B, Cin, HW).astype(jnp.float32)
    t = time_emb.reshape(B, Tdim, 1).astype(jnp.float32)

    # weights as (Cout, K) so all results come out (Cout, HW); cast to bf16 once
    w1 = jnp.transpose(params["w1"], (3, 0, 1, 2)).reshape(Cout, 9 * Cin).astype(bf16)
    w2 = jnp.transpose(params["w2"], (3, 0, 1, 2)).reshape(Cout, 9 * Cout).astype(bf16)
    wt = params["wt"].T.astype(bf16)                            # (Cout, Tdim)

    col = lambda v: v.reshape(-1, 1).astype(jnp.float32)
    consts = jnp.concatenate(
        [col(params["b1"]), col(params["g1"]), col(params["beta1"]),
         col(params["b2"]), col(params["g2"]), col(params["beta2"]),
         col(params["bt"]),
         col(params["bres"]) if has_res else jnp.zeros((Cout, 1), jnp.float32)],
        axis=1)                                                 # (Cout, 8)

    pgrp = _group_same_matrix(Cout, groups)                     # (Cout, Cout)

    operands = [x, t, consts, wt, w1, w2, pgrp]
    full = lambda shape: pl.BlockSpec(shape, lambda b: (0,) * len(shape))
    in_specs = [
        pl.BlockSpec((1, Cin, HW), lambda b: (b, 0, 0)),
        pl.BlockSpec((1, Tdim, 1), lambda b: (b, 0, 0)),
        full((Cout, 8)), full((Cout, Tdim)),
        full((Cout, 9 * Cin)), full((Cout, 9 * Cout)),
        full((Cout, Cout)),
    ]
    if has_res:
        operands.append(params["wres"].T.astype(bf16))          # (Cout, Cin)
        in_specs.append(full((Cout, Cin)))

    out = pl.pallas_call(
        functools.partial(_resnet_block_kernel, W=W, groups=groups,
                          lpad=LPAD, has_res_conv=has_res),
        out_shape=jax.ShapeDtypeStruct((B, Cout, HW), jnp.float32),
        grid=(B,),
        in_specs=in_specs,
        out_specs=pl.BlockSpec((1, Cout, HW), lambda b: (b, 0, 0)),
        compiler_params=pltpu.CompilerParams(
            dimension_semantics=("parallel",)),
    )(*operands)
    return out.reshape(B, Cout, H, W)                            # NCHW out


# ----------------------------------------------------------------------------
# Pure-JAX reference (correctness check). Mirrors the kernel's MXU precision
# (bf16 operands, f32 accumulation); math otherwise identical to PyTorch.
# ----------------------------------------------------------------------------
def _bf16_round(v):
    return v.astype(jnp.bfloat16)


def _ref_silu(x):
    return x * jax.nn.sigmoid(x)


def _ref_group_norm(x, gamma, beta, groups, eps=EPS):
    B, H, W, C = x.shape
    xg = x.reshape(B, H, W, groups, C // groups)
    mean = xg.mean(axis=(1, 2, 4), keepdims=True)
    var = ((xg - mean) ** 2).mean(axis=(1, 2, 4), keepdims=True)
    xn = ((xg - mean) / jnp.sqrt(var + eps)).reshape(B, H, W, C)
    return xn * gamma.reshape(1, 1, 1, C) + beta.reshape(1, 1, 1, C)


def _ref_conv3x3(x, w, b):
    y = jax.lax.conv_general_dilated(
        _bf16_round(x), _bf16_round(w), window_strides=(1, 1), padding="SAME",
        dimension_numbers=("NHWC", "HWIO", "NHWC"),
        preferred_element_type=jnp.float32)
    return y + b.reshape(1, 1, 1, -1)


def _ref_forward(x_nchw, time_emb, params, groups):
    x = jnp.transpose(x_nchw, (0, 2, 3, 1)).astype(jnp.float32)
    temb = jnp.dot(_bf16_round(_ref_silu(time_emb)), _bf16_round(params["wt"]),
                   preferred_element_type=jnp.float32) + params["bt"]
    h = _ref_silu(_ref_group_norm(_ref_conv3x3(x, params["w1"], params["b1"]),
                                  params["g1"], params["beta1"], groups))
    h = h + temb[:, None, None, :]
    h = _ref_silu(_ref_group_norm(_ref_conv3x3(h, params["w2"], params["b2"]),
                                  params["g2"], params["beta2"], groups))
    if "wres" in params:
        res = jnp.einsum("bhwc,cd->bhwd", _bf16_round(x),
                         _bf16_round(params["wres"]),
                         preferred_element_type=jnp.float32) + params["bres"]
    else:
        res = x
    return jnp.transpose(h + res, (0, 3, 1, 2))


# ----------------------------------------------------------------------------
def make_params(key, dim, dim_out, time_emb_dim):
    ks = jax.random.split(key, 12)
    f = jnp.float32
    p = {
        "w1": 0.1 * jax.random.normal(ks[0], (3, 3, dim, dim_out), f),
        "b1": 0.05 * jax.random.normal(ks[1], (dim_out,), f),
        "g1": 1.0 + 0.1 * jax.random.normal(ks[2], (dim_out,), f),
        "beta1": 0.1 * jax.random.normal(ks[3], (dim_out,), f),
        "w2": 0.1 * jax.random.normal(ks[4], (3, 3, dim_out, dim_out), f),
        "b2": 0.05 * jax.random.normal(ks[5], (dim_out,), f),
        "g2": 1.0 + 0.1 * jax.random.normal(ks[6], (dim_out,), f),
        "beta2": 0.1 * jax.random.normal(ks[7], (dim_out,), f),
        "wt": 0.1 * jax.random.normal(ks[8], (time_emb_dim, dim_out), f),
        "bt": 0.05 * jax.random.normal(ks[9], (dim_out,), f),
    }
    if dim != dim_out:                      # nn.Conv2d(dim, dim_out, 1)
        p["wres"] = 0.1 * jax.random.normal(ks[10], (dim, dim_out), f)
        p["bres"] = 0.05 * jax.random.normal(ks[11], (dim_out,), f)
    # else: nn.Identity() -> no residual conv params (plain skip in kernel)
    return p


if __name__ == "__main__":
    B, H, W = 2, 16, 16
    groups, time_emb_dim = 8, 32
    key = jax.random.PRNGKey(0)

    # Case 0: dim != dim_out (1x1 residual conv). Case 1: identity residual.
    for case_i, (dim, dim_out) in enumerate([(4, 16), (16, 16)]):
        kx, kt, kp = jax.random.split(jax.random.fold_in(key, case_i), 3)
        x = jax.random.normal(kx, (B, dim, H, W), jnp.float32)     # NCHW input
        time_emb = jax.random.normal(kt, (B, time_emb_dim), jnp.float32)
        params = make_params(kp, dim, dim_out, time_emb_dim)

        out = jax.block_until_ready(
            resnet_block_forward(x, time_emb, params, groups=groups))
        assert out.shape == (B, dim_out, H, W)

        ref = jax.block_until_ready(_ref_forward(x, time_emb, params, groups))
        np.testing.assert_allclose(np.asarray(out), np.asarray(ref),
                                   rtol=5e-3, atol=5e-3)

    print("KERNEL_OK")
</pallas_src>

<mosaic_0001>
module attributes {stable_mosaic.version = 11 : i64} {
  func.func @_resnet_block_kernel(%arg0: i32, %arg1: memref<1x4x256xf32, #tpu.memory_space<vmem>>, %arg2: memref<1x32x1xf32, #tpu.memory_space<vmem>>, %arg3: memref<16x8xf32, #tpu.memory_space<vmem>>, %arg4: memref<16x32xbf16, #tpu.memory_space<vmem>>, %arg5: memref<16x36xbf16, #tpu.memory_space<vmem>>, %arg6: memref<16x144xbf16, #tpu.memory_space<vmem>>, %arg7: memref<16x16xf32, #tpu.memory_space<vmem>>, %arg8: memref<16x4xbf16, #tpu.memory_space<vmem>>, %arg9: memref<1x16x256xf32, #tpu.memory_space<vmem>>) attributes {dimension_semantics = [#tpu.dimension_semantics<parallel>], iteration_bounds = array<i64: 2>, scalar_prefetch = 0 : i64, scratch_operands = 0 : i64, tpu.core_type = #tpu.core_type<tc>, window_params = [{transform_indices = @transform_0, window_bounds = array<i64: 1, 4, 256>}, {transform_indices = @transform_1, window_bounds = array<i64: 1, 32, 1>}, {pipeline_mode = #tpu.pipeline_mode<synchronous>, transform_indices = @transform_2, window_bounds = array<i64: 16, 8>}, {pipeline_mode = #tpu.pipeline_mode<synchronous>, transform_indices = @transform_3, window_bounds = array<i64: 16, 32>}, {pipeline_mode = #tpu.pipeline_mode<synchronous>, transform_indices = @transform_4, window_bounds = array<i64: 16, 36>}, {pipeline_mode = #tpu.pipeline_mode<synchronous>, transform_indices = @transform_5, window_bounds = array<i64: 16, 144>}, {pipeline_mode = #tpu.pipeline_mode<synchronous>, transform_indices = @transform_6, window_bounds = array<i64: 16, 16>}, {pipeline_mode = #tpu.pipeline_mode<synchronous>, transform_indices = @transform_7, window_bounds = array<i64: 16, 4>}, {transform_indices = @transform_8, window_bounds = array<i64: 1, 16, 256>}]} {
    %c0 = arith.constant 0 : index
    %c0_0 = arith.constant 0 : index
    %0 = vector.load %arg3[%c0, %c0_0] : memref<16x8xf32, #tpu.memory_space<vmem>>, vector<16x8xf32>
    %1 = vector.extract_strided_slice %0 {offsets = [0, 0], sizes = [16, 1], strides = [1, 1]} : vector<16x8xf32> to vector<16x1xf32>
    %2 = vector.extract_strided_slice %0 {offsets = [0, 1], sizes = [16, 1], strides = [1, 1]} : vector<16x8xf32> to vector<16x1xf32>
    %3 = vector.extract_strided_slice %0 {offsets = [0, 2], sizes = [16, 1], strides = [1, 1]} : vector<16x8xf32> to vector<16x1xf32>
    %4 = vector.extract_strided_slice %0 {offsets = [0, 3], sizes = [16, 1], strides = [1, 1]} : vector<16x8xf32> to vector<16x1xf32>
    %5 = vector.extract_strided_slice %0 {offsets = [0, 4], sizes = [16, 1], strides = [1, 1]} : vector<16x8xf32> to vector<16x1xf32>
    %6 = vector.extract_strided_slice %0 {offsets = [0, 5], sizes = [16, 1], strides = [1, 1]} : vector<16x8xf32> to vector<16x1xf32>
    %7 = vector.extract_strided_slice %0 {offsets = [0, 6], sizes = [16, 1], strides = [1, 1]} : vector<16x8xf32> to vector<16x1xf32>
    %8 = vector.extract_strided_slice %0 {offsets = [0, 7], sizes = [16, 1], strides = [1, 1]} : vector<16x8xf32> to vector<16x1xf32>
    %c0_1 = arith.constant 0 : index
    %c0_2 = arith.constant 0 : index
    %9 = vector.load %arg7[%c0_1, %c0_2] : memref<16x16xf32, #tpu.memory_space<vmem>>, vector<16x16xf32>
    %10 = tpu.iota {dimensions = array<i32: 1>} : vector<1x256xi32>
    %c16_i32 = arith.constant 16 : i32
    %c0_i32 = arith.constant 0 : i32
    %11 = arith.cmpi eq, %c16_i32, %c0_i32 : i32
    %c1_i32 = arith.constant 1 : i32
    %12 = arith.select %11, %c1_i32, %c16_i32 : i32
    %13 = vector.broadcast %12 : i32 to vector<1x256xi32>
    %14 = arith.remsi %10, %13 : vector<1x256xi32>
    %c0_i32_3 = arith.constant 0 : i32
    %15 = vector.broadcast %c0_i32_3 : i32 to vector<1x256xi32>
    %16 = arith.cmpi ne, %14, %15 : vector<1x256xi32>
    %c0_i32_4 = arith.constant 0 : i32
    %17 = vector.broadcast %c0_i32_4 : i32 to vector<1x256xi32>
    %18 = arith.cmpi slt, %14, %17 : vector<1x256xi32>
    %c0_i32_5 = arith.constant 0 : i32
    %19 = arith.cmpi slt, %12, %c0_i32_5 : i32
    %20 = vector.broadcast %19 : i1 to vector<1x256xi1>
    %21 = vector.broadcast %20 : vector<1x256xi1> to vector<1x256xi1>
    %22 = arith.xori %18, %21 : vector<1x256xi1>
    %23 = arith.andi %22, %16 : vector<1x256xi1>
    %24 = vector.broadcast %12 : i32 to vector<1x256xi32>
    %25 = arith.addi %14, %24 : vector<1x256xi32>
    %26 = arith.select %23, %25, %14 : vector<1x256xi1>, vector<1x256xi32>
    %c0_i32_6 = arith.constant 0 : i32
    %27 = vector.broadcast %c0_i32_6 : i32 to vector<1x256xi32>
    %28 = arith.cmpi sgt, %26, %27 : vector<1x256xi32>
    %c15_i32 = arith.constant 15 : i32
    %29 = vector.broadcast %c15_i32 : i32 to vector<1x256xi32>
    %30 = arith.cmpi slt, %26, %29 : vector<1x256xi32>
    %c0_7 = arith.constant 0 : index
    %c0_8 = arith.constant 0 : index
    %c0_9 = arith.constant 0 : index
    %31 = vector.load %arg1[%c0_7, %c0_8, %c0_9] : memref<1x4x256xf32, #tpu.memory_space<vmem>>, vector<1x4x256xf32>
    %32 = vector.shape_cast %31 : vector<1x4x256xf32> to vector<4x256xf32>
    %cst = arith.constant 0.000000e+00 : bf16
    %33 = vector.broadcast %cst : bf16 to vector<4x128xbf16>
    %34 = arith.truncf %32 : vector<4x256xf32> to vector<4x256xbf16>
    %35 = tpu.concatenate %33, %34, %33 in 1 : vector<4x128xbf16>, vector<4x256xbf16>, vector<4x128xbf16> -> vector<4x512xbf16>
    %36 = vector.extract_strided_slice %35 {offsets = [0, 111], sizes = [4, 256], strides = [1, 1]} : vector<4x512xbf16> to vector<4x256xbf16>
    %c0_i32_10 = arith.constant 0 : i32
    %37 = arith.sitofp %c0_i32_10 : i32 to bf16
    %38 = vector.shape_cast %28 : vector<1x256xi1> to vector<1x256xi1>
    %39 = vector.broadcast %38 : vector<1x256xi1> to vector<4x256xi1>
    %40 = vector.broadcast %37 : bf16 to vector<4x256xbf16>
    %41 = arith.select %39, %36, %40 : vector<4x256xi1>, vector<4x256xbf16>
    %42 = vector.extract_strided_slice %35 {offsets = [0, 112], sizes = [4, 256], strides = [1, 1]} : vector<4x512xbf16> to vector<4x256xbf16>
    %43 = vector.extract_strided_slice %35 {offsets = [0, 113], sizes = [4, 256], strides = [1, 1]} : vector<4x512xbf16> to vector<4x256xbf16>
    %c0_i32_11 = arith.constant 0 : i32
    %44 = arith.sitofp %c0_i32_11 : i32 to bf16
    %45 = vector.shape_cast %30 : vector<1x256xi1> to vector<1x256xi1>
    %46 = vector.broadcast %45 : vector<1x256xi1> to vector<4x256xi1>
    %47 = vector.broadcast %44 : bf16 to vector<4x256xbf16>
    %48 = arith.select %46, %43, %47 : vector<4x256xi1>, vector<4x256xbf16>
    %49 = vector.extract_strided_slice %35 {offsets = [0, 127], sizes = [4, 256], strides = [1, 1]} : vector<4x512xbf16> to vector<4x256xbf16>
    %c0_i32_12 = arith.constant 0 : i32
    %50 = arith.sitofp %c0_i32_12 : i32 to bf16
    %51 = vector.shape_cast %28 : vector<1x256xi1> to vector<1x256xi1>
    %52 = vector.broadcast %51 : vector<1x256xi1> to vector<4x256xi1>
    %53 = vector.broadcast %50 : bf16 to vector<4x256xbf16>
    %54 = arith.select %52, %49, %53 : vector<4x256xi1>, vector<4x256xbf16>
    %55 = vector.extract_strided_slice %35 {offsets = [0, 128], sizes = [4, 256], strides = [1, 1]} : vector<4x512xbf16> to vector<4x256xbf16>
    %56 = vector.extract_strided_slice %35 {offsets = [0, 129], sizes = [4, 256], strides = [1, 1]} : vector<4x512xbf16> to vector<4x256xbf16>
    %c0_i32_13 = arith.constant 0 : i32
    %57 = arith.sitofp %c0_i32_13 : i32 to bf16
    %58 = vector.shape_cast %30 : vector<1x256xi1> to vector<1x256xi1>
    %59 = vector.broadcast %58 : vector<1x256xi1> to vector<4x256xi1>
    %60 = vector.broadcast %57 : bf16 to vector<4x256xbf16>
    %61 = arith.select %59, %56, %60 : vector<4x256xi1>, vector<4x256xbf16>
    %62 = vector.extract_strided_slice %35 {offsets = [0, 143], sizes = [4, 256], strides = [1, 1]} : vector<4x512xbf16> to vector<4x256xbf16>
    %c0_i32_14 = arith.constant 0 : i32
    %63 = arith.sitofp %c0_i32_14 : i32 to bf16
    %64 = vector.shape_cast %28 : vector<1x256xi1> to vector<1x256xi1>
    %65 = vector.broadcast %64 : vector<1x256xi1> to vector<4x256xi1>
    %66 = vector.broadcast %63 : bf16 to vector<4x256xbf16>
    %67 = arith.select %65, %62, %66 : vector<4x256xi1>, vector<4x256xbf16>
    %68 = vector.extract_strided_slice %35 {offsets = [0, 144], sizes = [4, 256], strides = [1, 1]} : vector<4x512xbf16> to vector<4x256xbf16>
    %69 = vector.extract_strided_slice %35 {offsets = [0, 145], sizes = [4, 256], strides = [1, 1]} : vector<4x512xbf16> to vector<4x256xbf16>
    %c0_i32_15 = arith.constant 0 : i32
    %70 = arith.sitofp %c0_i32_15 : i32 to bf16
    %71 = vector.shape_cast %30 : vector<1x256xi1> to vector<1x256xi1>
    %72 = vector.broadcast %71 : vector<1x256xi1> to vector<4x256xi1>
    %73 = vector.broadcast %70 : bf16 to vector<4x256xbf16>
    %74 = arith.select %72, %69, %73 : vector<4x256xi1>, vector<4x256xbf16>
    %75 = tpu.concatenate %41, %42, %48, %54, %55, %61, %67, %68, %74 in 0 : vector<4x256xbf16>, vector<4x256xbf16>, vector<4x256xbf16>, vector<4x256xbf16>, vector<4x256xbf16>, vector<4x256xbf16>, vector<4x256xbf16>, vector<4x256xbf16>, vector<4x256xbf16> -> vector<36x256xbf16>
    %c0_16 = arith.constant 0 : index
    %c0_17 = arith.constant 0 : index
    %76 = vector.load %arg5[%c0_16, %c0_17] : memref<16x36xbf16, #tpu.memory_space<vmem>>, vector<16x36xbf16>
    %cst_18 = arith.constant dense<0.000000e+00> : vector<16x256xf32>
    %77 = tpu.matmul %76, %75, %cst_18 {dimension_numbers = #tpu.dot_dimension_numbers<[1], [0], [0], [1], [0, 0, 1, 1], [], []>} : vector<16x36xbf16>, vector<36x256xbf16>, vector<16x256xf32> -> vector<16x256xf32>
    %78 = vector.broadcast %1 : vector<16x1xf32> to vector<16x256xf32>
    %79 = arith.addf %77, %78 : vector<16x256xf32>
    %cst_19 = arith.constant dense<0.000000e+00> : vector<16xf32>
    %80 = vector.multi_reduction <add>, %79, %cst_19 [1] : vector<16x256xf32> to vector<16xf32>
    %81 = vector.shape_cast %80 : vector<16xf32> to vector<16x1xf32>
    %cst_20 = arith.constant dense<0.000000e+00> : vector<16x1xf32>
    %82 = tpu.matmul %9, %81, %cst_20 {dimension_numbers = #tpu.dot_dimension_numbers<[1], [0], [0], [1], [0, 0, 1, 1], [], []>} : vector<16x16xf32>, vector<16x1xf32>, vector<16x1xf32> -> vector<16x1xf32>
    %cst_21 = arith.constant 5.120000e+02 : f32
    %83 = vector.broadcast %cst_21 : f32 to vector<16x1xf32>
    %84 = arith.divf %82, %83 : vector<16x1xf32>
    %85 = vector.broadcast %84 : vector<16x1xf32> to vector<16x256xf32>
    %86 = arith.subf %79, %85 : vector<16x256xf32>
    %87 = arith.mulf %86, %86 : vector<16x256xf32>
    %cst_22 = arith.constant dense<0.000000e+00> : vector<16xf32>
    %88 = vector.multi_reduction <add>, %87, %cst_22 [1] : vector<16x256xf32> to vector<16xf32>
    %89 = vector.shape_cast %88 : vector<16xf32> to vector<16x1xf32>
    %cst_23 = arith.constant dense<0.000000e+00> : vector<16x1xf32>
    %90 = tpu.matmul %9, %89, %cst_23 {dimension_numbers = #tpu.dot_dimension_numbers<[1], [0], [0], [1], [0, 0, 1, 1], [], []>} : vector<16x16xf32>, vector<16x1xf32>, vector<16x1xf32> -> vector<16x1xf32>
    %cst_24 = arith.constant 5.120000e+02 : f32
    %91 = vector.broadcast %cst_24 : f32 to vector<16x1xf32>
    %92 = arith.divf %90, %91 : vector<16x1xf32>
    %cst_25 = arith.constant 9.99999974E-6 : f32
    %93 = vector.broadcast %cst_25 : f32 to vector<16x1xf32>
    %94 = arith.addf %92, %93 : vector<16x1xf32>
    %95 = math.rsqrt %94 : vector<16x1xf32>
    %96 = vector.broadcast %95 : vector<16x1xf32> to vector<16x256xf32>
    %97 = arith.mulf %86, %96 : vector<16x256xf32>
    %98 = vector.broadcast %2 : vector<16x1xf32> to vector<16x256xf32>
    %99 = arith.mulf %97, %98 : vector<16x256xf32>
    %100 = vector.broadcast %3 : vector<16x1xf32> to vector<16x256xf32>
    %101 = arith.addf %99, %100 : vector<16x256xf32>
    %102 = arith.negf %101 : vector<16x256xf32>
    %103 = math.exp %102 : vector<16x256xf32>
    %cst_26 = arith.constant 1.000000e+00 : f32
    %104 = vector.broadcast %cst_26 : f32 to vector<16x256xf32>
    %105 = arith.addf %104, %103 : vector<16x256xf32>
    %106 = arith.divf %104, %105 : vector<16x256xf32>
    %107 = arith.mulf %101, %106 : vector<16x256xf32>
    %c0_27 = arith.constant 0 : index
    %c0_28 = arith.constant 0 : index
    %c0_29 = arith.constant 0 : index
    %108 = vector.load %arg2[%c0_27, %c0_28, %c0_29] : memref<1x32x1xf32, #tpu.memory_space<vmem>>, vector<1x32x1xf32>
    %109 = vector.shape_cast %108 : vector<1x32x1xf32> to vector<32x1xf32>
    %110 = arith.negf %109 : vector<32x1xf32>
    %111 = math.exp %110 : vector<32x1xf32>
    %cst_30 = arith.constant 1.000000e+00 : f32
    %112 = vector.broadcast %cst_30 : f32 to vector<32x1xf32>
    %113 = arith.addf %112, %111 : vector<32x1xf32>
    %114 = arith.divf %112, %113 : vector<32x1xf32>
    %115 = arith.mulf %109, %114 : vector<32x1xf32>
    %116 = arith.truncf %115 : vector<32x1xf32> to vector<32x1xbf16>
    %c0_31 = arith.constant 0 : index
    %c0_32 = arith.constant 0 : index
    %117 = vector.load %arg4[%c0_31, %c0_32] : memref<16x32xbf16, #tpu.memory_space<vmem>>, vector<16x32xbf16>
    %cst_33 = arith.constant dense<0.000000e+00> : vector<16x1xf32>
    %118 = tpu.matmul %117, %116, %cst_33 {dimension_numbers = #tpu.dot_dimension_numbers<[1], [0], [0], [1], [0, 0, 1, 1], [], []>} : vector<16x32xbf16>, vector<32x1xbf16>, vector<16x1xf32> -> vector<16x1xf32>
    %119 = arith.addf %118, %7 : vector<16x1xf32>
    %120 = vector.broadcast %119 : vector<16x1xf32> to vector<16x256xf32>
    %121 = arith.addf %107, %120 : vector<16x256xf32>
    %cst_34 = arith.constant 0.000000e+00 : bf16
    %122 = vector.broadcast %cst_34 : bf16 to vector<16x128xbf16>
    %123 = arith.truncf %121 : vector<16x256xf32> to vector<16x256xbf16>
    %124 = tpu.concatenate %122, %123, %122 in 1 : vector<16x128xbf16>, vector<16x256xbf16>, vector<16x128xbf16> -> vector<16x512xbf16>
    %125 = vector.extract_strided_slice %124 {offsets = [0, 111], sizes = [16, 256], strides = [1, 1]} : vector<16x512xbf16> to vector<16x256xbf16>
    %c0_i32_35 = arith.constant 0 : i32
    %126 = arith.sitofp %c0_i32_35 : i32 to bf16
    %127 = vector.shape_cast %28 : vector<1x256xi1> to vector<1x256xi1>
    %128 = vector.broadcast %127 : vector<1x256xi1> to vector<16x256xi1>
    %129 = vector.broadcast %126 : bf16 to vector<16x256xbf16>
    %130 = arith.select %128, %125, %129 : vector<16x256xi1>, vector<16x256xbf16>
    %131 = vector.extract_strided_slice %124 {offsets = [0, 112], sizes = [16, 256], strides = [1, 1]} : vector<16x512xbf16> to vector<16x256xbf16>
    %132 = vector.extract_strided_slice %124 {offsets = [0, 113], sizes = [16, 256], strides = [1, 1]} : vector<16x512xbf16> to vector<16x256xbf16>
    %c0_i32_36 = arith.constant 0 : i32
    %133 = arith.sitofp %c0_i32_36 : i32 to bf16
    %134 = vector.shape_cast %30 : vector<1x256xi1> to vector<1x256xi1>
    %135 = vector.broadcast %134 : vector<1x256xi1> to vector<16x256xi1>
    %136 = vector.broadcast %133 : bf16 to vector<16x256xbf16>
    %137 = arith.select %135, %132, %136 : vector<16x256xi1>, vector<16x256xbf16>
    %138 = vector.extract_strided_slice %124 {offsets = [0, 127], sizes = [16, 256], strides = [1, 1]} : vector<16x512xbf16> to vector<16x256xbf16>
    %c0_i32_37 = arith.constant 0 : i32
    %139 = arith.sitofp %c0_i32_37 : i32 to bf16
    %140 = vector.shape_cast %28 : vector<1x256xi1> to vector<1x256xi1>
    %141 = vector.broadcast %140 : vector<1x256xi1> to vector<16x256xi1>
    %142 = vector.broadcast %139 : bf16 to vector<16x256xbf16>
    %143 = arith.select %141, %138, %142 : vector<16x256xi1>, vector<16x256xbf16>
    %144 = vector.extract_strided_slice %124 {offsets = [0, 128], sizes = [16, 256], strides = [1, 1]} : vector<16x512xbf16> to vector<16x256xbf16>
    %145 = vector.extract_strided_slice %124 {offsets = [0, 129], sizes = [16, 256], strides = [1, 1]} : vector<16x512xbf16> to vector<16x256xbf16>
    %c0_i32_38 = arith.constant 0 : i32
    %146 = arith.sitofp %c0_i32_38 : i32 to bf16
    %147 = vector.shape_cast %30 : vector<1x256xi1> to vector<1x256xi1>
    %148 = vector.broadcast %147 : vector<1x256xi1> to vector<16x256xi1>
    %149 = vector.broadcast %146 : bf16 to vector<16x256xbf16>
    %150 = arith.select %148, %145, %149 : vector<16x256xi1>, vector<16x256xbf16>
    %151 = vector.extract_strided_slice %124 {offsets = [0, 143], sizes = [16, 256], strides = [1, 1]} : vector<16x512xbf16> to vector<16x256xbf16>
    %c0_i32_39 = arith.constant 0 : i32
    %152 = arith.sitofp %c0_i32_39 : i32 to bf16
    %153 = vector.shape_cast %28 : vector<1x256xi1> to vector<1x256xi1>
    %154 = vector.broadcast %153 : vector<1x256xi1> to vector<16x256xi1>
    %155 = vector.broadcast %152 : bf16 to vector<16x256xbf16>
    %156 = arith.select %154, %151, %155 : vector<16x256xi1>, vector<16x256xbf16>
    %157 = vector.extract_strided_slice %124 {offsets = [0, 144], sizes = [16, 256], strides = [1, 1]} : vector<16x512xbf16> to vector<16x256xbf16>
    %158 = vector.extract_strided_slice %124 {offsets = [0, 145], sizes = [16, 256], strides = [1, 1]} : vector<16x512xbf16> to vector<16x256xbf16>
    %c0_i32_40 = arith.constant 0 : i32
    %159 = arith.sitofp %c0_i32_40 : i32 to bf16
    %160 = vector.shape_cast %30 : vector<1x256xi1> to vector<1x256xi1>
    %161 = vector.broadcast %160 : vector<1x256xi1> to vector<16x256xi1>
    %162 = vector.broadcast %159 : bf16 to vector<16x256xbf16>
    %163 = arith.select %161, %158, %162 : vector<16x256xi1>, vector<16x256xbf16>
    %164 = tpu.concatenate %130, %131, %137, %143, %144, %150, %156, %157, %163 in 0 : vector<16x256xbf16>, vector<16x256xbf16>, vector<16x256xbf16>, vector<16x256xbf16>, vector<16x256xbf16>, vector<16x256xbf16>, vector<16x256xbf16>, vector<16x256xbf16>, vector<16x256xbf16> -> vector<144x256xbf16>
    %c0_41 = arith.constant 0 : index
    %c0_42 = arith.constant 0 : index
    %165 = vector.load %arg6[%c0_41, %c0_42] : memref<16x144xbf16, #tpu.memory_space<vmem>>, vector<16x144xbf16>
    %cst_43 = arith.constant dense<0.000000e+00> : vector<16x256xf32>
    %166 = tpu.matmul %165, %164, %cst_43 {dimension_numbers = #tpu.dot_dimension_numbers<[1], [0], [0], [1], [0, 0, 1, 1], [], []>} : vector<16x144xbf16>, vector<144x256xbf16>, vector<16x256xf32> -> vector<16x256xf32>
    %167 = vector.broadcast %4 : vector<16x1xf32> to vector<16x256xf32>
    %168 = arith.addf %166, %167 : vector<16x256xf32>
    %cst_44 = arith.constant dense<0.000000e+00> : vector<16xf32>
    %169 = vector.multi_reduction <add>, %168, %cst_44 [1] : vector<16x256xf32> to vector<16xf32>
    %170 = vector.shape_cast %169 : vector<16xf32> to vector<16x1xf32>
    %cst_45 = arith.constant dense<0.000000e+00> : vector<16x1xf32>
    %171 = tpu.matmul %9, %170, %cst_45 {dimension_numbers = #tpu.dot_dimension_numbers<[1], [0], [0], [1], [0, 0, 1, 1], [], []>} : vector<16x16xf32>, vector<16x1xf32>, vector<16x1xf32> -> vector<16x1xf32>
    %cst_46 = arith.constant 5.120000e+02 : f32
    %172 = vector.broadcast %cst_46 : f32 to vector<16x1xf32>
    %173 = arith.divf %171, %172 : vector<16x1xf32>
    %174 = vector.broadcast %173 : vector<16x1xf32> to vector<16x256xf32>
    %175 = arith.subf %168, %174 : vector<16x256xf32>
    %176 = arith.mulf %175, %175 : vector<16x256xf32>
    %cst_47 = arith.constant dense<0.000000e+00> : vector<16xf32>
    %177 = vector.multi_reduction <add>, %176, %cst_47 [1] : vector<16x256xf32> to vector<16xf32>
    %178 = vector.shape_cast %177 : vector<16xf32> to vector<16x1xf32>
    %cst_48 = arith.constant dense<0.000000e+00> : vector<16x1xf32>
    %179 = tpu.matmul %9, %178, %cst_48 {dimension_numbers = #tpu.dot_dimension_numbers<[1], [0], [0], [1], [0, 0, 1, 1], [], []>} : vector<16x16xf32>, vector<16x1xf32>, vector<16x1xf32> -> vector<16x1xf32>
    %cst_49 = arith.constant 5.120000e+02 : f32
    %180 = vector.broadcast %cst_49 : f32 to vector<16x1xf32>
    %181 = arith.divf %179, %180 : vector<16x1xf32>
    %cst_50 = arith.constant 9.99999974E-6 : f32
    %182 = vector.broadcast %cst_50 : f32 to vector<16x1xf32>
    %183 = arith.addf %181, %182 : vector<16x1xf32>
    %184 = math.rsqrt %183 : vector<16x1xf32>
    %185 = vector.broadcast %184 : vector<16x1xf32> to vector<16x256xf32>
    %186 = arith.mulf %175, %185 : vector<16x256xf32>
    %187 = vector.broadcast %5 : vector<16x1xf32> to vector<16x256xf32>
    %188 = arith.mulf %186, %187 : vector<16x256xf32>
    %189 = vector.broadcast %6 : vector<16x1xf32> to vector<16x256xf32>
    %190 = arith.addf %188, %189 : vector<16x256xf32>
    %191 = arith.negf %190 : vector<16x256xf32>
    %192 = math.exp %191 : vector<16x256xf32>
    %cst_51 = arith.constant 1.000000e+00 : f32
    %193 = vector.broadcast %cst_51 : f32 to vector<16x256xf32>
    %194 = arith.addf %193, %192 : vector<16x256xf32>
    %195 = arith.divf %193, %194 : vector<16x256xf32>
    %196 = arith.mulf %190, %195 : vector<16x256xf32>
    %c0_52 = arith.constant 0 : index
    %c0_53 = arith.constant 0 : index
    %197 = vector.load %arg8[%c0_52, %c0_53] : memref<16x4xbf16, #tpu.memory_space<vmem>>, vector<16x4xbf16>
    %198 = arith.truncf %32 : vector<4x256xf32> to vector<4x256xbf16>
    %cst_54 = arith.constant dense<0.000000e+00> : vector<16x256xf32>
    %199 = tpu.matmul %197, %198, %cst_54 {dimension_numbers = #tpu.dot_dimension_numbers<[1], [0], [0], [1], [0, 0, 1, 1], [], []>} : vector<16x4xbf16>, vector<4x256xbf16>, vector<16x256xf32> -> vector<16x256xf32>
    %200 = vector.broadcast %8 : vector<16x1xf32> to vector<16x256xf32>
    %201 = arith.addf %199, %200 : vector<16x256xf32>
    %202 = arith.addf %196, %201 : vector<16x256xf32>
    %c0_55 = arith.constant 0 : index
    %c0_56 = arith.constant 0 : index
    %c0_57 = arith.constant 0 : index
    %203 = vector.load %arg9[%c0_55, %c0_56, %c0_57] : memref<1x16x256xf32, #tpu.memory_space<vmem>>, vector<1x16x256xf32>
    %204 = vector.shape_cast %203 : vector<1x16x256xf32> to vector<16x256xf32>
    %205 = vector.shape_cast %202 : vector<16x256xf32> to vector<1x16x256xf32>
    tpu.vector_store %arg9[%c0_55, %c0_56, %c0_57], %205 {strides = array<i32>} : memref<1x16x256xf32, #tpu.memory_space<vmem>>, vector<1x16x256xf32>,
    return
  }
  func.func @transform_0(%arg0: i32) -> (i32, i32, i32) {
    %c0_i32 = arith.constant 0 : i32
    %c0_i32_0 = arith.constant 0 : i32
    %c0_i32_1 = arith.constant 0 : i32
    return %arg0, %c0_i32, %c0_i32_0 : i32, i32, i32
  }
  func.func @transform_1(%arg0: i32) -> (i32, i32, i32) {
    %c0_i32 = arith.constant 0 : i32
    %c0_i32_0 = arith.constant 0 : i32
    %c0_i32_1 = arith.constant 0 : i32
    return %arg0, %c0_i32, %c0_i32_0 : i32, i32, i32
  }
  func.func @transform_2(%arg0: i32) -> (i32, i32) {
    %c0_i32 = arith.constant 0 : i32
    %c0_i32_0 = arith.constant 0 : i32
    %c0_i32_1 = arith.constant 0 : i32
    return %c0_i32, %c0_i32_0 : i32, i32
  }
  func.func @transform_3(%arg0: i32) -> (i32, i32) {
    %c0_i32 = arith.constant 0 : i32
    %c0_i32_0 = arith.constant 0 : i32
    %c0_i32_1 = arith.constant 0 : i32
    return %c0_i32, %c0_i32_0 : i32, i32
  }
  func.func @transform_4(%arg0: i32) -> (i32, i32) {
    %c0_i32 = arith.constant 0 : i32
    %c0_i32_0 = arith.constant 0 : i32
    %c0_i32_1 = arith.constant 0 : i32
    return %c0_i32, %c0_i32_0 : i32, i32
  }
  func.func @transform_5(%arg0: i32) -> (i32, i32) {
    %c0_i32 = arith.constant 0 : i32
    %c0_i32_0 = arith.constant 0 : i32
    %c0_i32_1 = arith.constant 0 : i32
    return %c0_i32, %c0_i32_0 : i32, i32
  }
  func.func @transform_6(%arg0: i32) -> (i32, i32) {
    %c0_i32 = arith.constant 0 : i32
    %c0_i32_0 = arith.constant 0 : i32
    %c0_i32_1 = arith.constant 0 : i32
    return %c0_i32, %c0_i32_0 : i32, i32
  }
  func.func @transform_7(%arg0: i32) -> (i32, i32) {
    %c0_i32 = arith.constant 0 : i32
    %c0_i32_0 = arith.constant 0 : i32
    %c0_i32_1 = arith.constant 0 : i32
    return %c0_i32, %c0_i32_0 : i32, i32
  }
  func.func @transform_8(%arg0: i32) -> (i32, i32, i32) {
    %c0_i32 = arith.constant 0 : i32
    %c0_i32_0 = arith.constant 0 : i32
    %c0_i32_1 = arith.constant 0 : i32
    return %arg0, %c0_i32, %c0_i32_0 : i32, i32, i32
  }
}

</mosaic_0001>

<bundles_post_ra>
// kernel: resnet_block_forward.1
= control target key start
LH: loop header
LB: loop body
LE: loop exit
PB: predicated region body
PF: predicated region fallthrough
CT: control target
= control target key end

     0   :  { %s2015_s27 = smov 0   ;;  %s2457_s0 = inlined_call_operand.vmem [shape: f32[2,4,256], index: 0, kind: input, shape index: {}]   ;;  %s2458_s1 = inlined_call_operand.vmem [shape: f32[2,32,1], index: 1, kind: input, shape index: {}]   ;;  %s2459_s2 = inlined_call_operand.vmem [shape: f32[16,8], index: 2, kind: input, shape index: {}]   ;;  %s2460_s3 = inlined_call_operand.vmem [shape: bf16[16,32], index: 3, kind: input, shape index: {}]   ;;  %s2461_s4 = inlined_call_operand.vmem [shape: bf16[16,36], index: 4, kind: input, shape index: {}]   ;;  %s2462_s5 = inlined_call_operand.vmem [shape: bf16[16,144], index: 5, kind: input, shape index: {}]   ;;  %s2463_s6 = inlined_call_operand.vmem [shape: f32[16,16], index: 6, kind: input, shape index: {}]   ;;  %s2464_s7 = inlined_call_operand.vmem [shape: bf16[16,4], index: 7, kind: input, shape index: {}]   ;;  %s2465_s8 = inlined_call_operand.vmem [shape: f32[2,16,256], index: 8, kind: output, shape index: {}]  }
   0x1 LB: > { %s1709_s28 = sadd.s32 4294967295, %s1946_s27   ;;  %p1713_p0 = scmp.ge.s32.totalorder %s1946_s27, 1  ;;  %s1946_s27 = sphi %s2015_s27, %s18_s27  }
   0x2   : > { %p272_p1 = scmp.lt.s32.totalorder %s1946_s27, 3 }
   0x4   : > { %p273_p2 = pnand %p1713_p0, %p272_p1 }
   0x5   : > { %v333_v0 = vlaneseq (!%p273_p2)  ;;  %v1948_v1 = vmov (!%p273_p2), 0   ;;  %p311_p3 = scmp.lt.s32.totalorder (!%p273_p2), %s1709_s28, 1  ;;  %s1949_s29 = smov (!%p273_p2), 113   ;;  %vm412_vm6 = vcmask (!%p273_p2), 924672   ;;  %vm422_vm9 = vcmask (!%p273_p2), 1039360  }
   0x6   : > { %276 = sbr.rel (%p273_p2) target bundleno = 3219 (0xc93), region = 52  ;;  %691 = vmatprep.mubr.bf16.mxu0 (!%p273_p2), %v1948_v1  ;;  %1857 = vset.pattern.permute.xlu0 (!%p273_p2), %v1948_v1  ;;  %s1950_s30 = smov (!%p273_p2), 127   ;;  %v461_v21 = vrot.slane (!%p273_p2), %v1948_v1, 6  ;;  %v474_v22 = vrot.slane (!%p273_p2), %v1948_v1, 4  ;;  %v2056_v23 = vrot.slane (!%p273_p2), %v1948_v1, 2  ;;  %vm432_vm12 = vcmask (!%p273_p2), 7168  }
   0x7   : > { %v334_v2 = vand.u32 (!%p273_p2), 127, %v333_v0  ;;  %1858 = vset.pattern.permute.xlu1 (!%p273_p2), %v1948_v1  ;;  %v377_v3 = vshrl.u32 (!%p273_p2), %v333_v0, 7  ;;  %s1951_s13 = smov (!%p273_p2), 1   ;;  %s1952_s14 = smov (!%p273_p2), 15   ;;  %vm442_vm13 = vcmask (!%p273_p2), 121856  }
   0x8   : > { %s1953_s15 = smov (!%p273_p2), 17   ;;  %s1954_s16 = smov (!%p273_p2), 111  }
   0x9   : > { %v335_v4 = vadd.s32 (!%p273_p2), 128, %v334_v2  ;;  %v340_v5 = vand.u32 (!%p273_p2), 15, %v334_v2  ;;  %v378_v7 = vsub.s32 (!%p273_p2), 0, %v377_v3  ;;  %v382_v8 = vsub.s32 (!%p273_p2), 4, %v377_v3  ;;  %s1955_s17 = smov (!%p273_p2), 126   ;;  %s1956_s18 = smov (!%p273_p2), 112  }
   0xa   : > { %s1957_s19 = smov (!%p273_p2), 110   ;;  %s1958_s20 = smov (!%p273_p2), 96  }
   0xb   : > { %v347_v6 = vand.u32 (!%p273_p2), 15, %v335_v4  ;;  %vm362_vm0 = vcmp.lt.s32.totalorder (!%p273_p2), %v340_v5, 15  ;;  %vm360_vm1 = vcmp.gt.s32.totalorder (!%p273_p2), %v340_v5, 0  ;;  %s1959_s21 = smov (!%p273_p2), 95   ;;  %s1960_s22 = smov (!%p273_p2), 94  }
   0xd   : > { %vm363_vm2 = vcmp.lt.s32.totalorder %v347_v6, 15  ;;  %vm361_vm3 = vcmp.gt.s32.totalorder %v347_v6, 0  ;;  %s2486_s28 = smov (!%p311_p3, %s1709_s28), 1 }
   0xe   : > { %vm398_vm4 = vmpackc.low %vm363_vm2, %vm362_vm0  ;;  %s1753_s9 = sshll.u32 %s2486_s28, 3  ;;  %vm452_vm2 = vcmask 138240   ;;  %s1754_s23 = sshll.u32 %s2486_s28, 5 }
   0xf   : > { %v399_v9 = vsel %vm398_vm4, 65537, %v1948_v1  ;;  %vm374_vm5 = vmpackc.low %vm361_vm3, %vm360_vm1  ;;  %s315_s12 = scalar_lea.vmem %s2457_s0, %s1753_s9  ;;  %s320_s26 = scalar_lea.vmem %s2458_s1, %s1754_s23 }
  0x10   : > { %v403_v10 = vrot.slane %v399_v9, %v378_v7  ;;  %v375_v11 = vsel %vm374_vm5, 65537, %v1948_v1  ;;  %v407_v13 = vrot.slane %v399_v9, %v382_v8  ;;  %v364_v15 = vld [vmem:[%s315_s12] sm:$0xff] }
  0x11   : > { %v379_v12 = vrot.slane %v375_v11, %v378_v7  ;;  %v383_v14 = vrot.slane %v375_v11, %v382_v8  ;;  %v366_v16 = vcombine.high %v364_v15, %v364_v15  ;;  %v2041_v17 = vpack.c.bf16 %v364_v15, %v364_v15 }
  0x12   : > { %408 = vrot.lane.b32.xlu0 %v403_v10, %s1949_s29 }
  0x13   : > { %418 = vrot.lane.b32.xlu1 %v379_v12, %s1950_s30  ;;  %v2044_v18 = vpack.c.bf16 %v366_v16, %v366_v16  ;;  %v462_v19 = vrot.slane %v2041_v17, 6  ;;  %v531_v24 = vrot.slane %v2041_v17, 2 }
  0x15   : > { %v463_v20 = vrot.slane %v2044_v18, 6  ;;  %v532_v25 = vrot.slane %v2044_v18, 2 }
  0x16   : > { %410 = vrot.lane.b32.xlu0 %v407_v13, %s1949_s29 }
  0x17   : > { %420 = vrot.lane.b32.xlu1 %v383_v14, %s1950_s30 }
  0x1a   : > { %428 = vrot.lane.b32.xlu0 %v403_v10, %s1951_s13 }
  0x1b   : > { %430 = vrot.lane.b32.xlu1 %v407_v13, %s1951_s13 }
  0x1e   : > { %438 = vrot.lane.b32.xlu0 %v379_v12, %s1952_s14 }
  0x1f   : > { %440 = vrot.lane.b32.xlu1 %v383_v14, %s1952_s14  ;;  %s1961_s14 = smov 122  }
  0x22   : > { %448 = vrot.lane.b32.xlu0 %v403_v10, %s1953_s15 }
  0x23   : > { %450 = vrot.lane.b32.xlu1 %v407_v13, %s1953_s15 }
  0x26   : > { %384 = vrot.lane.b32.xlu0 %v379_v12, %s1954_s16 }
  0x27   : > { %386 = vrot.lane.b32.xlu1 %v383_v14, %s1954_s16 }
  0x2a   : > { %466 = vrot.lane.b32.xlu0 %v462_v19, %s1950_s30 }
  0x2b   : > { %468 = vrot.lane.b32.xlu1 %v463_v20, %s1950_s30 }
  0x2e   : > { %464 = vrot.lane.b32.xlu0 %v461_v21, %s1950_s30 }
  0x2f   : > { %477 = vrot.lane.b32.xlu1 %v474_v22, %s1955_s17 }
  0x32   : > { %491 = vrot.lane.b32.xlu0 %v2056_v23, %s1956_s18 }
  0x33   : > { %500 = vrot.lane.b32.xlu1 %v2041_v17, %s1954_s16 }
  0x36   : > { %502 = vrot.lane.b32.xlu0 %v2044_v18, %s1954_s16 }
  0x37   : > { %513 = vrot.lane.b32.xlu1 %v461_v21, %s1957_s19 }
  0x3a   : > { %526 = vrot.lane.b32.xlu0 %v474_v22, %s1958_s20 }
  0x3b   : > { %533 = vrot.lane.b32.xlu1 %v531_v24, %s1959_s21 }
  0x3e   : > { %535 = vrot.lane.b32.xlu0 %v532_v25, %s1959_s21 }
  0x84   : > { %v409_v26 = vpop.permute.xlu0 %408 }
  0x85   : > { %v419_v27 = vpop.permute.xlu1 %418 }
  0x88   : > { %v2071_v28 = vpop.permute.xlu0 %410 }
  0x89   : > { %vm415_vm7 = vcmp.ne.s16.totalorder %v2071_v28, 0  ;;  %v2074_v29 = vpop.permute.xlu1 %420  ;;  %v2081_v31 = vsel %vm412_vm6, %v409_v26, %v2071_v28  ;;  %vm563_vm6 = vcmask 1043456  }
  0x8a   : > { %vm425_vm8 = vcmp.ne.s16.totalorder %v2074_v29, 0  ;;  %v417_v30 = vsel %vm415_vm7, %v2044_v18, 0  ;;  %vm414_vm11 = vcmp.ne.s16.totalorder %v2081_v31, 0  ;;  %v2093_v37 = vsel %vm422_vm9, %v419_v27, %v2074_v29 }
  0x8b   : > { %v427_v32 = vsel %vm425_vm8, %v2044_v18, 0  ;;  %v476_v33 = vrot.slane %v417_v30, 4  ;;  %vm424_vm14 = vcmp.ne.s16.totalorder %v2093_v37, 0  ;;  %v416_v42 = vsel %vm414_vm11, %v2041_v17, 0 }
  0x8c   : > { %v2086_v34 = vpop.permute.xlu0 %428  ;;  %v490_v35 = vrot.slane %v427_v32, 2  ;;  %v475_v47 = vrot.slane %v416_v42, 4  ;;  %v426_v48 = vsel %vm424_vm14, %v2041_v17, 0 }
  0x8d   : > { %vm2471_vm10 = vcmp.ne.s16.totalorder %v2086_v34, 0  ;;  %v431_v36 = vpop.permute.xlu1 %430  ;;  %481 = vrot.lane.b32.xlu0 %v476_v33, %s1955_s17  ;;  %v489_v52 = vrot.slane %v426_v48, 2 }
  0x8e   : > { %495 = vrot.lane.b32.xlu1 %v490_v35, %s1956_s18  ;;  %v436_v38 = vsel %vm2471_vm10, %v2041_v17, 0  ;;  %v2107_v43 = vsel %vm432_vm12, %v2086_v34, %v431_v36  ;;  %vm2474_vm12 = vcmask 1041408   ;;  %vm483_vm10 = vcmask 1031168  }
  0x8f   : > { %v507_v39 = vrot.slane %v436_v38, 6  ;;  %vm2472_vm1 = vcmp.ne.s16.totalorder %v2107_v43, 0 }
  0x90   : > { %v2099_v40 = vpop.permute.xlu0 %438  ;;  %v437_v53 = vsel %vm2472_vm1, %v2044_v18, 0  ;;  %vm497_vm1 = vcmask 916480  }
  0x91   : > { %vm2470_vm15 = vcmp.ne.s16.totalorder %v2099_v40, 0  ;;  %v441_v41 = vpop.permute.xlu1 %440  ;;  %v508_v56 = vrot.slane %v437_v53, 6 }
  0x92   : > { %v2110_v44 = vsel %vm442_vm13, %v2099_v40, %v441_v41  ;;  %509 = vrot.lane.b32.xlu1 %v507_v39, %s1957_s19  ;;  %v446_v45 = vsel %vm2470_vm15, %v2041_v17, 0  ;;  %vm570_vm13 = vcmask 1045504   ;;  %vm539_vm15 = vcmask 777216  }
  0x93   : > { %vm2469_vm0 = vcmp.ne.s16.totalorder %v2110_v44, 0  ;;  %v520_v46 = vrot.slane %v446_v45, 4 }
  0x94   : > { %v447_v49 = vsel %vm2469_vm0, %v2044_v18, 0  ;;  %v2126_v50 = vpop.permute.xlu0 %448 }
  0x95   : > { %522 = vrot.lane.b32.xlu0 %v520_v46, %s1958_s20  ;;  %v451_v51 = vpop.permute.xlu1 %450  ;;  %v521_v54 = vrot.slane %v447_v49, 4  ;;  %vm2468_vm3 = vcmp.ne.s16.totalorder %v2126_v50, 0 }
  0x96   : > { %479 = vrot.lane.b32.xlu1 %v475_v47, %s1955_s17  ;;  %v2134_v55 = vsel %vm452_vm2, %v2126_v50, %v451_v51  ;;  %v456_v57 = vsel %vm2468_vm3, %v2041_v17, 0  ;;  %vm528_vm3 = vcmask 785408  }
  0x97   : > { %vm2467_vm4 = vcmp.ne.s16.totalorder %v2134_v55, 0 }
  0x98   : > { %v457_v58 = vsel %vm2467_vm4, %v2044_v18, 0  ;;  %v385_v59 = vpop.permute.xlu0 %384  ;;  %vm515_vm4 = vcmask 900096  }
  0x99   : > { %493 = vrot.lane.b32.xlu0 %v489_v52, %s1956_s18  ;;  %v2152_v61 = vpop.permute.xlu1 %386 }
  0x9a   : > { %524 = vrot.lane.b32.xlu1 %v521_v54, %s1958_s20  ;;  %vm2466_vm5 = vcmp.ne.s16.totalorder %v2152_v61, 0 }
  0x9b   : > { %v393_v9 = vsel %vm2466_vm5, %v2044_v18, 0  ;;  %vm2473_vm5 = vcmask 908288  }
  0x9c   : > { %v467_v60 = vpop.permute.xlu0 %466  ;;  %v2174_v24 = vsel %vm2473_vm5, %v385_v59, %v2152_v61 }
  0x9d   : > { %511 = vrot.lane.b32.xlu0 %v508_v56, %s1957_s19  ;;  %v469_v63 = vpop.permute.xlu1 %468  ;;  %vm390_vm0 = vcmp.ne.s16.totalorder %v2174_v24, 0 }
  0x9e   : > { %537 = vrot.lane.b32.xlu1 %v2056_v23, %s1959_s21  ;;  %v562_v10 = vsel %vm2474_vm12, %v393_v9, %v469_v63  ;;  %v392_v36 = vsel %vm390_vm0, %v2041_v17, 0  ;;  %v471_v38 = vsel %vm422_vm9, %v467_v60, %v469_v63  ;;  %v2231_v9 = vld [vmem:[%s2459_s2 + $0x8] sm:$0xff] }
  0x9f   : > { %v559_v49 = vsel %vm2474_vm12, %v392_v36, %v471_v38 }
  0xa0   : > { %v465_v62 = vpop.permute.xlu0 %464 }
  0xa1   : > { %544 = vrot.lane.b32.xlu0 %v456_v57, %s1960_s22  ;;  %v478_v2 = vpop.permute.xlu1 %477  ;;  %v470_v51 = vsel %vm422_vm9, %v465_v62, %v467_v60 }
  0xa2   : > { %546 = vrot.lane.b32.xlu1 %v457_v58, %s1960_s22  ;;  %v556_v59 = vsel %vm2474_vm12, 0, %v470_v51 }
  0xa4   : > { %v492_v0 = vpop.permute.xlu0 %491 }
  0xa5   : > { %548 = vrot.lane.b32.xlu0 %v1948_v1, %s1960_s22  ;;  %v501_v4 = vpop.permute.xlu1 %500 }
  0xa8   : > { %v2154_v3 = vpop.permute.xlu0 %502 }
  0xa9   : > { %v514_v6 = vpop.permute.xlu1 %513  ;;  %v504_v27 = vsel %vm2473_vm5, %v501_v4, %v2154_v3  ;;  %vm550_vm5 = vcmask 769024  }
  0xac   : > { %v2156_v5 = vpop.permute.xlu0 %526 }
  0xad   : > { %v534_v8 = vpop.permute.xlu1 %533 }
  0xb0   : > { %v2159_v7 = vpop.permute.xlu0 %535 }
  0xb1   : > { %v540_v39 = vsel %vm539_vm15, %v534_v8, %v2159_v7 }
  0xff   : > { %v482_v11 = vpop.permute.xlu0 %481 }
 0x100   : > { %v496_v12 = vpop.permute.xlu1 %495  ;;  %v569_v13 = vsel %vm563_vm6, %v562_v10, %v482_v11 }
 0x101   : > { %v576_v14 = vsel %vm570_vm13, %v569_v13, %v496_v12 }
 0x102   : > { %625 = vrot.lane.b32.xlu0 %v576_v14, %s1953_s15 }
 0x104   : > { %v510_v15 = vpop.permute.xlu1 %509 }
 0x105   : > { %v579_v16 = vsel %vm2474_vm12, %v501_v4, %v510_v15  ;;  %v2216_v4 = vld [vmem:[%s2459_s2] sm:$0xff] }
 0x107   : > { %v523_v19 = vpop.permute.xlu0 %522 }
 0x108   : > { %v480_v20 = vpop.permute.xlu1 %479  ;;  %v587_v21 = vsel %vm563_vm6, %v579_v16, %v523_v19 }
 0x109   : > { %v593_v22 = vsel %vm570_vm13, %v587_v21, %v534_v8  ;;  %v485_v42 = vsel %vm483_vm10, %v480_v20, %v482_v11  ;;  %v484_v54 = vsel %vm483_vm10, %v478_v2, %v480_v20 }
 0x10a   : > { %627 = vrot.lane.b32.xlu0 %v593_v22, %s1953_s15  ;;  %v567_v53 = vsel %vm563_vm6, %v559_v49, %v485_v42  ;;  %v565_v62 = vsel %vm563_vm6, %v556_v59, %v484_v54  ;;  %v2248_v49 = vld [vmem:[%s2463_s6] sm:$0xff]  ;;  %v2255_v54 = vld [vmem:[%s2463_s6 + $0x8] sm:$0xff] }
 0x10b   : > { %v494_v23 = vpop.permute.xlu0 %493 }
 0x10c   : > { %v525_v25 = vpop.permute.xlu1 %524  ;;  %v499_v47 = vsel %vm497_vm1, %v494_v23, %v496_v12  ;;  %v498_v58 = vsel %vm497_vm1, %v492_v0, %v494_v23 }
 0x10d   : > { %v529_v33 = vsel %vm528_vm3, %v523_v19, %v525_v25  ;;  %v574_v56 = vsel %vm570_vm13, %v567_v53, %v499_v47  ;;  %v530_v63 = vsel %vm528_vm3, %v525_v25, %v2156_v5  ;;  %v572_v2 = vsel %vm570_vm13, %v565_v62, %v498_v58 }
 0x10f   : > { %v512_v26 = vpop.permute.xlu0 %511 }
 0x110   : > { %v538_v30 = vpop.permute.xlu1 %537  ;;  %v516_v32 = vsel %vm515_vm4, %v510_v15, %v512_v26  ;;  %v517_v52 = vsel %vm515_vm4, %v512_v26, %v514_v6 }
 0x111   : > { %v582_v35 = vsel %vm2474_vm12, %v504_v27, %v516_v32  ;;  %v585_v60 = vsel %vm2474_vm12, %v2154_v3, %v517_v52  ;;  %v541_v3 = vsel %vm539_vm15, %v2159_v7, %v538_v30  ;;  %v1878_v30 = vld [vmem:[%s2461_s4] sm:$0xff]  }
 0x112   : > { %v589_v41 = vsel %vm563_vm6, %v582_v35, %v529_v33  ;;  %v591_v0 = vsel %vm563_vm6, %v585_v60, %v530_v63  ;;  %vm649_vm6 = vcmask 293888  }
 0x113   : > { %v545_v45 = vpop.permute.xlu0 %544  ;;  %v595_v46 = vsel %vm570_vm13, %v589_v41, %v540_v39  ;;  %v597_v6 = vsel %vm570_vm13, %v591_v0, %v541_v3  ;;  %vm708_vm13 = vcmask 130048  }
 0x114   : > { %v547_v48 = vpop.permute.xlu1 %546  ;;  %633 = vrot.lane.b32.xlu1 %v545_v45, %s1953_s15  ;;  %629 = vrot.lane.b32.xlu0 %v595_v46, %s1953_s15 }
 0x115   : > { %v551_v57 = vsel %vm550_vm5, %v545_v45, %v547_v48  ;;  %1779 = vmatprep.mubr.msk.f32.mxu1 %vm708_vm13, %v2248_v49 }
 0x117   : > { %v2222_v8 = vpop.permute.xlu0 %548 }
 0x118   : > { %623 = vrot.lane.b32.xlu1 %v574_v56, %s1953_s15  ;;  %635 = vrot.lane.b32.xlu0 %v551_v57, %s1953_s15  ;;  %v552_v5 = vsel %vm550_vm5, %v547_v48, %v2222_v8 }
 0x11c   : > { %621 = vrot.lane.b32.xlu1 %v572_v2, %s1953_s15  ;;  %602 = vperm.xlu0 %1857, %v2216_v4  }
 0x120   : > { %631 = vrot.lane.b32.xlu1 %v597_v6, %s1953_s15 }
 0x124   : > { %637 = vrot.lane.b32.xlu1 %v552_v5, %s1953_s15 }
 0x128   : > { %607 = vperm.xlu1 %1858, %v2231_v9  }
 0x174   : > { %v626_v10 = vpop.permute.xlu0 %625 }
 0x17c   : > { %v628_v11 = vpop.permute.xlu0 %627 }
 0x186   : > { %v634_v7 = vpop.permute.xlu1 %633  ;;  %v630_v14 = vpop.permute.xlu0 %629 }
 0x187   : > { %v641_v22 = vsel %vm452_vm2, %v628_v11, %v630_v14 }
 0x18a   : > { %v624_v12 = vpop.permute.xlu1 %623  ;;  %v636_v19 = vpop.permute.xlu0 %635 }
 0x18b   : > { %v640_v13 = vsel %vm452_vm2, %v624_v12, %v626_v10  ;;  %v643_v23 = vsel %vm452_vm2, %v634_v7, %v636_v19 }
 0x18c   : > { %659 = vmatprep.subr.bf16.mxu0 %v640_v13  ;;  %v654_v27 = vsel %vm2474_vm12, %v643_v23, 0  ;;  %v964_v13 = vld [vmem:[%s320_s26] sm:$0xff] }
 0x18e   : > { %v622_v15 = vpop.permute.xlu1 %621 }
 0x18f   : > { %v639_v16 = vsel %vm452_vm2, %v622_v15, %v624_v12  ;;  %v1731_v15 = vmul.f32 -1.442695, %v964_v13 }
 0x190   : > { %660 = vmatpush1.bf16.msra.mxu0 %v639_v16 }
 0x191   : > { %1884 = vpow2.f32 %v1731_v15 }
 0x192   : > { %v632_v20 = vpop.permute.xlu1 %631 }
 0x193   : > { %v642_v21 = vsel %vm452_vm2, %v630_v14, %v632_v20  ;;  %v965_v14 = vld [vmem:[%s320_s26 + $0x8] sm:$0xff]  ;;  %v967_v20 = vld [vmem:[%s320_s26 + $0x18] sm:$0xff] }
 0x194   : > { %661 = vmatprep.subr.bf16.mxu0 %v642_v21  ;;  %v1732_v16 = vmul.f32 -1.442695, %v965_v14 }
 0x195   : > { %662 = vmatpush1.bf16.msra.mxu0 %v641_v22  ;;  %v1734_v22 = vmul.f32 -1.442695, %v967_v20 }
 0x196   : > { %v638_v25 = vpop.permute.xlu1 %637  ;;  %1886 = vpow2.f32 %v1732_v16 }
 0x197   : > { %v644_v26 = vsel %vm452_vm2, %v636_v19, %v638_v25  ;;  %v966_v19 = vld [vmem:[%s320_s26 + $0x10] sm:$0xff] }
 0x198   : > { %1721 = vmatprep.subr.msk.bf16.mxu0 %vm2474_vm12, %v644_v26  ;;  %v1733_v21 = vmul.f32 -1.442695, %v966_v19  ;;  %vm1011_vm12 = vcmask 261120  }
 0x199   : > { %664 = vmatpush1.bf16.msra.mxu0 %v654_v27 }
 0x19a   : > { %1888 = vpow2.f32 %v1733_v21 }
 0x19b   : > { %v603_v32 = vpop.permute.xlu0 %602  ;;  %1890 = vpow2.f32 %v1734_v22  ;;  %v1885_v23 = vpop.eup %1884 }
 0x19c   : > { %1722 = vmatmul.mubr.msk.bf16.vlgmr.msra.gmra.mrb[0].mxu0 %vm649_vm6, %v1878_v30  ;;  %v980_v26 = vadd.f32 1.0, %v1885_v23  ;;  %vm1963_vm6 = vmmov 0  }
 0x19e   : > { %1892 = vrcp.f32 %v980_v26 }
 0x1a0   : > { %v1887_v25 = vpop.eup %1886 }
 0x1a1   : > { %v981_v30 = vadd.f32 1.0, %v1887_v25 }
 0x1a3   : > { %1894 = vrcp.f32 %v981_v30 }
 0x1a4   : > { %v1889_v27 = vpop.eup %1888 }
 0x1a7   : > { %v608_v35 = vpop.permute.xlu1 %607 }
 0x26f   : > { %v693_v33 = vpop.f32.mrb[0].mxu0 }
 0x270   : > { %v694_v36 = vadd.f32 %v693_v33, %v603_v32  ;;  %v695_v38 = vpop.f32.mrb[1].mxu0  ;;  %v982_v33 = vadd.f32 1.0, %v1889_v27 }
 0x271   : > { %v696_v39 = vadd.f32 %v695_v38, %v603_v32  ;;  %v697_v41 = vpop.f32.mrb[2].mxu0  ;;  %v1891_v32 = vpop.eup %1890 }
 0x272   : > { %v698_v42 = vadd.f32 %v697_v41, %v608_v35  ;;  %v699_v45 = vpop.f32.mrb[3].mxu0  ;;  %1896 = vrcp.f32 %v982_v33 }
 0x273   : > { %v700_v46 = vadd.f32 %v699_v45, %v608_v35  ;;  %v702_v47 = vadd.f32 %v696_v39, %v694_v36  ;;  %v983_v35 = vadd.f32 1.0, %v1891_v32 }
 0x275   : > { %703 = vadd.xlane.f32.xlu1 %v702_v47  ;;  %v705_v48 = vadd.f32 %v700_v46, %v698_v42  ;;  %1898 = vrcp.f32 %v983_v35 }
 0x277   : > { %706 = vadd.xlane.f32.xlu0 %v705_v48 }
 0x302   : > { %v704_v51 = vpop.xlane.xlu1 %703 }
 0x304   : > { %v707_v52 = vpop.xlane.xlu0 %706 }
 0x305   : > { %v1811_v53 = vpack.c.bf16 %v707_v52, %v704_v51 }
 0x307   : > { %1812 = vmatprep.subr.bf16.mxu1 %v1811_v53 }
 0x308   : > { %1814 = vmatpush3.bf16.msra.mxu1 %v1811_v53 }
 0x30b   : > { %1780 = vmatmul.mubr.msk.f32.vlgmr.msra.gmra.mrb[0].mxu1 %vm708_vm13, %v2255_v54 }
 0x30c   : > { %1786 = vmatprep.mubr.msk.f32.mxu1 %vm708_vm13, %v2248_v49 }
 0x3de   : > { %v1781_v56 = vpop.f32.mrb[0].mxu1 }
 0x3df   : > { %v792_v57 = vmul.f32 0.001953125, %v1781_v56  ;;  %v781_v58 = vpop.f32.mrb[1].mxu1  ;;  %v1962_v56 = vmov 0.0  }
 0x3e0   : > { %v791_v59 = vmul.f32 0.001953125, %v781_v58  ;;  %v1879_v58 = vld [vmem:[%s2460_s3] sm:$0xff]  }
 0x3e1   : > { %800 = vperm.xlu1 %1858, %v792_v57  }
 0x3e2   : > { %795 = vperm.xlu0 %1857, %v791_v59   ;;  %v1964_v59 = vmov 1  }
 0x3e5   : > { %1859 = vset.pattern.permute.xlu1 %v1964_v59 }
 0x460   : > { %v801_v60 = vpop.permute.xlu1 %800 }
 0x461   : > { %v2261_v62 = vsub.f32 %v698_v42, %v801_v60  ;;  %v2263_v63 = vsub.f32 %v700_v46, %v801_v60  ;;  %v796_v2 = vpop.permute.xlu0 %795  ;;  %v1965_v60 = vmov 2  }
 0x462   : > { %v2265_v0 = vsub.f32 %v694_v36, %v796_v2  ;;  %v2267_v3 = vsub.f32 %v696_v39, %v796_v2  ;;  %v1893_v36 = vpop.eup %1892 }
 0x463   : > { %v809_v6 = vmul.f32 %v2261_v62, %v2261_v62  ;;  %v810_v5 = vmul.f32 %v2263_v63, %v2263_v63  ;;  %v1895_v38 = vpop.eup %1894  ;;  %v992_v45 = vmul.f32 %v1893_v36, %v964_v13 }
 0x464   : > { %v807_v10 = vmul.f32 %v2265_v0, %v2265_v0  ;;  %v808_v7 = vmul.f32 %v2267_v3, %v2267_v3  ;;  %v1897_v41 = vpop.eup %1896  ;;  %v993_v46 = vmul.f32 %v1895_v38, %v965_v14 }
 0x465   : > { %v814_v11 = vadd.f32 %v810_v5, %v809_v6  ;;  %v1899_v47 = vpop.eup %1898  ;;  %v994_v52 = vmul.f32 %v1897_v41, %v966_v19 }
 0x466   : > { %v811_v12 = vadd.f32 %v808_v7, %v807_v10  ;;  %v996_v51 = vpack.c.bf16 %v993_v46, %v992_v45  ;;  %v995_v53 = vmul.f32 %v1899_v47, %v967_v20 }
 0x467   : > { %815 = vadd.xlane.f32.xlu0 %v814_v11 }
 0x468   : > { %812 = vadd.xlane.f32.xlu1 %v811_v12  ;;  %v997_v57 = vpack.c.bf16 %v995_v53, %v994_v52 }
 0x479   : > { %1007 = vrot.lane.b32.xlu1 %v2231_v9, %s1961_s14 }
 0x47d   : > { %1005 = vrot.lane.b32.xlu0 %v2216_v4, %s1961_s14  ;;  %913 = vperm.xlu1 %1859, %v2216_v4  }
 0x481   : > { %1861 = vset.pattern.permute.xlu1 %v1965_v60 }
 0x482   : > { %925 = vperm.xlu1 %1861, %v2216_v4  }
 0x486   : > { %1862 = vset.pattern.permute.xlu1 %v1948_v1 }
 0x4f4   : > { %v816_v39 = vpop.xlane.xlu0 %815 }
 0x4f5   : > { %v813_v42 = vpop.xlane.xlu1 %812 }
 0x4f6   : > { %v1815_v48 = vpack.c.bf16 %v816_v39, %v813_v42 }
 0x4f8   : > { %1816 = vmatprep.subr.bf16.mxu1 %v1815_v48  ;;  %v1006_v20 = vpop.permute.xlu0 %1005 }
 0x4f9   : > { %1818 = vmatpush3.bf16.msra.mxu1 %v1815_v48  ;;  %v1008_v21 = vpop.permute.xlu1 %1007 }
 0x4fa   : > { %1789 = vmatprep.subr.bf16.mxu1 %v1962_v56 }
 0x4fc   : > { %1787 = vmatmul.mubr.msk.f32.vlgmr.msra.gmra.mrb[2].mxu1 %vm708_vm13, %v2255_v54 }
 0x4fd   : > { %1790 = vmatpush3.bf16.msra.mxu1 %v996_v51  ;;  %1793 = vmatprep.mubr.msk.bf16.mxu1 %vm1963_vm6, %v1962_v56  ;;  %v914_v25 = vpop.permute.xlu1 %913  ;;  %vm2480_vm6 = vcmp.ne.s16.totalorder %v2134_v55, 0 }
 0x4fe   : > { %1791 = vmatprep.subr.bf16.mxu1 %v1962_v56 }
 0x501   : > { %1792 = vmatpush3.bf16.msra.mxu1 %v997_v57  ;;  %v926_v26 = vpop.permute.xlu1 %925 }
 0x504   : > { %1794 = vmatmul.mubr.msk.bf16.vlgmr.msra.gmra.mrb[4].mxu1 %vm1011_vm12, %v1879_v58  ;;  %vm2479_vm12 = vcmp.ne.s16.totalorder %v2126_v50, 0 }
 0x505   : > { %1801 = vmatprep.mubr.msk.f32.mxu1 %vm708_vm13, %v2248_v49 }
 0x5cf   : > { %v1788_v2 = vpop.f32.mrb[2].mxu1 }
 0x5d0   : > { %v893_v6 = vmul.f32 0.001953125, %v1788_v2  ;;  %v883_v5 = vpop.f32.mrb[3].mxu1 }
 0x5d1   : > { %v892_v10 = vmul.f32 0.001953125, %v883_v5 }
 0x5d2   : > { %v895_v7 = vadd.f32 1e-05, %v893_v6 }
 0x5d3   : > { %v894_v11 = vadd.f32 1e-05, %v892_v10 }
 0x5d4   : > { %1900 = vrsqrt.f32 %v895_v7 }
 0x5d5   : > { %1902 = vrsqrt.f32 %v894_v11 }
 0x5d7   : > { %v1049_v12 = vpop.f32.mrb[4].mxu1 }
 0x5d8   : > { %v1795_v13 = vpop.f32.mrb[5].mxu1  ;;  %v1050_v22 = vadd.f32 %v1049_v12, %v1006_v20 }
 0x5d9   : > { %v1052_v14 = vpop.f32.mrb[6].mxu1 }
 0x5da   : > { %v1796_v15 = vpop.f32.mrb[7].mxu1  ;;  %v1053_v23 = vadd.f32 %v1052_v14, %v1008_v21 }
 0x5de   : > { %v1901_v16 = vpop.eup %1900 }
 0x5df   : > { %v1903_v19 = vpop.eup %1902  ;;  %905 = vperm.xlu0 %1857, %v1901_v16  }
 0x5e0   : > { %900 = vperm.xlu1 %1862, %v1903_v19  }
 0x5e3   : > { %1860 = vset.pattern.permute.xlu0 %v1964_v59 }
 0x5e4   : > { %917 = vperm.xlu0 %1860, %v2231_v9   ;;  %1863 = vset.pattern.permute.xlu1 %v1965_v60 }
 0x5e5   : > { %929 = vperm.xlu1 %1863, %v2231_v9  }
 0x5e8   : > { %1864 = vset.pattern.permute.xlu0 %v1948_v1 }
 0x5e9   : > { %1865 = vset.pattern.permute.xlu1 %v1948_v1  ;;  %1058 = vperm.xlu0 %1864, %v1050_v22  }
 0x5ea   : > { %1063 = vperm.xlu1 %1865, %v1053_v23  }
 0x5ed   : > { %1096 = vrot.lane.b32.xlu0 %v1948_v1, %s1955_s17 }
 0x5ee   : > { %1086 = vrot.lane.b32.xlu1 %v1948_v1, %s1950_s30 }
 0x5f1   : > { %1125 = vrot.lane.b32.xlu0 %v1948_v1, %s1957_s19 }
 0x5f2   : > { %1106 = vrot.lane.b32.xlu1 %v1948_v1, %s1956_s18 }
 0x65e   : > { %v906_v27 = vpop.permute.xlu0 %905 }
 0x65f   : > { %v901_v30 = vpop.permute.xlu1 %900  ;;  %v910_v35 = vmul.f32 %v906_v27, %v2261_v62  ;;  %v911_v36 = vmul.f32 %v906_v27, %v2263_v63 }
 0x660   : > { %v908_v32 = vmul.f32 %v901_v30, %v2265_v0  ;;  %v909_v33 = vmul.f32 %v901_v30, %v2267_v3 }
 0x662   : > { %v920_v38 = vmul.f32 %v914_v25, %v908_v32  ;;  %v921_v39 = vmul.f32 %v914_v25, %v909_v33 }
 0x663   : > { %v918_v41 = vpop.permute.xlu0 %917 }
 0x664   : > { %v922_v42 = vmul.f32 %v918_v41, %v910_v35  ;;  %v923_v45 = vmul.f32 %v918_v41, %v911_v36  ;;  %v930_v46 = vpop.permute.xlu1 %929  ;;  %v932_v47 = vadd.f32 %v926_v26, %v920_v38  ;;  %v933_v48 = vadd.f32 %v926_v26, %v921_v39 }
 0x666   : > { %v934_v51 = vadd.f32 %v930_v46, %v922_v42  ;;  %v935_v52 = vadd.f32 %v930_v46, %v923_v45  ;;  %v1727_v53 = vmul.f32 -1.442695, %v932_v47  ;;  %v1728_v56 = vmul.f32 -1.442695, %v933_v48 }
 0x668   : > { %v1729_v57 = vmul.f32 -1.442695, %v934_v51  ;;  %v1730_v0 = vmul.f32 -1.442695, %v935_v52  ;;  %1904 = vpow2.f32 %v1727_v53  ;;  %v1059_v13 = vpop.permute.xlu0 %1058 }
 0x669   : > { %1906 = vpow2.f32 %v1728_v56  ;;  %v1064_v16 = vpop.permute.xlu1 %1063 }
 0x66a   : > { %1908 = vpow2.f32 %v1729_v57 }
 0x66b   : > { %1910 = vpow2.f32 %v1730_v0 }
 0x66c   : > { %v1097_v35 = vpop.permute.xlu0 %1096 }
 0x66d   : > { %v1087_v50 = vpop.permute.xlu1 %1086 }
 0x670   : > { %v1126_v55 = vpop.permute.xlu0 %1125 }
 0x671   : > { %v1107_v36 = vpop.permute.xlu1 %1106 }
 0x672   : > { %v1905_v62 = vpop.eup %1904 }
 0x673   : > { %v1907_v63 = vpop.eup %1906  ;;  %v948_v3 = vadd.f32 1.0, %v1905_v62 }
 0x674   : > { %v1909_v58 = vpop.eup %1908  ;;  %v949_v59 = vadd.f32 1.0, %v1907_v63 }
 0x675   : > { %v1911_v60 = vpop.eup %1910  ;;  %v950_v2 = vadd.f32 1.0, %v1909_v58  ;;  %1912 = vrcp.f32 %v948_v3 }
 0x676   : > { %v951_v6 = vadd.f32 1.0, %v1911_v60  ;;  %1914 = vrcp.f32 %v949_v59 }
 0x677   : > { %1916 = vrcp.f32 %v950_v2 }
 0x678   : > { %1918 = vrcp.f32 %v951_v6 }
 0x67f   : > { %v1913_v5 = vpop.eup %1912 }
 0x680   : > { %v1915_v10 = vpop.eup %1914  ;;  %v960_v7 = vmul.f32 %v1913_v5, %v932_v47 }
 0x681   : > { %v1917_v11 = vpop.eup %1916  ;;  %v961_v12 = vmul.f32 %v1915_v10, %v933_v48 }
 0x682   : > { %v1919_v14 = vpop.eup %1918  ;;  %v962_v15 = vmul.f32 %v1917_v11, %v934_v51  ;;  %v1066_v21 = vadd.f32 %v1059_v13, %v960_v7 }
 0x683   : > { %v963_v19 = vmul.f32 %v1919_v14, %v935_v52  ;;  %v1067_v23 = vadd.f32 %v1059_v13, %v961_v12  ;;  %v1880_v14 = vld [vmem:[%s2462_s5 + $0x4] ss:$8 sps:$4 sm:$0xff]  }
 0x684   : > { %v1068_v20 = vadd.f32 %v1064_v16, %v962_v15  ;;  %1739 = vmatprep.mubr.msk.bf16.mxu0 %vm708_vm13, %v1880_v14 }
 0x685   : > { %v1069_v22 = vadd.f32 %v1064_v16, %v963_v19 }
 0x686   : > { %v1070_v25 = vpack.c.bf16 %v1068_v20, %v1066_v21 }
 0x687   : > { %v1071_v26 = vpack.c.bf16 %v1069_v22, %v1067_v23  ;;  %v1966_v23 = vmov 3  }
 0x688   : > { %1088 = vrot.lane.b32.xlu1 %v1070_v25, %s1950_s30  ;;  %v1074_v30 = vsel %vm414_vm11, %v1070_v25, 0  ;;  %v1076_v32 = vsel %vm424_vm14, %v1070_v25, 0  ;;  %vm2476_vm11 = vcmp.ne.s16.totalorder %v2086_v34, 0  ;;  %vm2477_vm14 = vcmp.ne.s16.totalorder %v2099_v40, 0  ;;  %1866 = vset.pattern.permute.xlu0 %v1966_v23 }
 0x689   : > { %1090 = vrot.lane.b32.xlu0 %v1071_v26, %s1950_s30  ;;  %v1075_v27 = vsel %vm415_vm7, %v1071_v26, 0  ;;  %v1077_v33 = vsel %vm425_vm8, %v1071_v26, 0  ;;  %vm2475_vm7 = vcmp.ne.s16.totalorder %v2107_v43, 0  ;;  %v1078_v31 = vsel %vm2476_vm11, %v1070_v25, 0  ;;  %1867 = vset.pattern.permute.xlu1 %v1966_v23 }
 0x68a   : > { %v1079_v28 = vsel %vm2475_vm7, %v1071_v26, 0  ;;  %v1080_v29 = vsel %vm2477_vm14, %v1070_v25, 0  ;;  %vm2478_vm8 = vcmp.ne.s16.totalorder %v2110_v44, 0  ;;  %v1082_v34 = vsel %vm2479_vm12, %v1070_v25, 0 }
 0x68b   : > { %v1081_v37 = vsel %vm2478_vm8, %v1071_v26, 0  ;;  %v1083_v40 = vsel %vm2480_vm6, %v1071_v26, 0  ;;  %vm2481_vm7 = vcmp.ne.s16.totalorder %v2152_v61, 0  ;;  %v1072_v44 = vsel %vm390_vm0, %v1070_v25, 0 }
 0x68c   : > { %1116 = vrot.lane.b32.xlu1 %v1071_v26, %s1954_s16  ;;  %v1073_v43 = vsel %vm2481_vm7, %v1071_v26, 0  ;;  %vm2482_vm0 = vcmask 908288  }
 0x68d   : > { %1114 = vrot.lane.b32.xlu0 %v1070_v25, %s1954_s16 }
 0x690   : > { %1100 = vrot.lane.b32.xlu1 %v1075_v27, %s1955_s17 }
 0x691   : > { %1098 = vrot.lane.b32.xlu0 %v1074_v30, %s1955_s17 }
 0x694   : > { %1108 = vrot.lane.b32.xlu1 %v1076_v32, %s1956_s18 }
 0x695   : > { %1110 = vrot.lane.b32.xlu0 %v1077_v33, %s1956_s18 }
 0x698   : > { %1135 = vrot.lane.b32.xlu1 %v1948_v1, %s1958_s20 }
 0x699   : > { %1139 = vrot.lane.b32.xlu0 %v1070_v25, %s1959_s21 }
 0x69c   : > { %1123 = vrot.lane.b32.xlu1 %v1079_v28, %s1957_s19 }
 0x69d   : > { %1121 = vrot.lane.b32.xlu0 %v1078_v31, %s1957_s19 }
 0x6a0   : > { %1131 = vrot.lane.b32.xlu1 %v1080_v29, %s1958_s20 }
 0x6a1   : > { %1133 = vrot.lane.b32.xlu0 %v1081_v37, %s1958_s20 }
 0x6a4   : > { %1141 = vrot.lane.b32.xlu1 %v1071_v26, %s1959_s21 }
 0x6a5   : > { %1143 = vrot.lane.b32.xlu0 %v1948_v1, %s1959_s21 }
 0x6a8   : > { %1149 = vrot.lane.b32.xlu1 %v1082_v34, %s1960_s22 }
 0x6a9   : > { %1151 = vrot.lane.b32.xlu0 %v1083_v40, %s1960_s22  ;;  %s325_s22 = scalar_lea.vmem %s2465_s8, %s1754_s23 }
 0x6ac   : > { %1176 = vrot.lane.b32.xlu1 %v1948_v1, %s1953_s15 }
 0x6ad   : > { %1180 = vrot.lane.b32.xlu0 %v1073_v43, %s1953_s15 }
 0x6b0   : > { %1178 = vrot.lane.b32.xlu1 %v1072_v44, %s1953_s15 }
 0x6fa   : > { %v1089_v38 = vpop.permute.xlu1 %1088 }
 0x6fb   : > { %v1091_v39 = vpop.permute.xlu0 %1090  ;;  %v1092_v47 = vsel %vm422_vm9, %v1087_v50, %v1089_v38 }
 0x6fc   : > { %1186 = vrot.lane.b32.xlu1 %v1091_v39, %s1953_s15  ;;  %v1093_v24 = vsel %vm422_vm9, %v1089_v38, %v1091_v39  ;;  %vm2483_vm9 = vcmask 1041408  }
 0x6fe   : > { %v1117_v41 = vpop.permute.xlu1 %1116 }
 0x6ff   : > { %v1115_v42 = vpop.permute.xlu0 %1114  ;;  %1204 = vrot.lane.b32.xlu0 %v1117_v41, %s1953_s15 }
 0x700   : > { %1200 = vrot.lane.b32.xlu1 %v1115_v42, %s1953_s15  ;;  %v1118_v53 = vsel %vm2482_vm0, %v1115_v42, %v1117_v41 }
 0x702   : > { %v1101_v61 = vpop.permute.xlu1 %1100 }
 0x703   : > { %v1099_v45 = vpop.permute.xlu0 %1098  ;;  %1184 = vrot.lane.b32.xlu0 %v1093_v24, %s1953_s15 }
 0x704   : > { %v1103_v57 = vsel %vm483_vm10, %v1099_v45, %v1101_v61  ;;  %v1102_v63 = vsel %vm483_vm10, %v1097_v35, %v1099_v45  ;;  %vm2484_vm10 = vmmov %vm2483_vm9 }
 0x706   : > { %v1109_v46 = vpop.permute.xlu1 %1108 }
 0x707   : > { %v1111_v48 = vpop.permute.xlu0 %1110  ;;  %1182 = vrot.lane.b32.xlu0 %v1092_v47, %s1953_s15  ;;  %v1112_v2 = vsel %vm497_vm1, %v1107_v36, %v1109_v46 }
 0x708   : > { %1198 = vrot.lane.b32.xlu1 %v1111_v48, %s1953_s15  ;;  %v1113_v58 = vsel %vm497_vm1, %v1109_v46, %v1111_v48 }
 0x70a   : > { %v1136_v51 = vpop.permute.xlu1 %1135 }
 0x70b   : > { %v1140_v52 = vpop.permute.xlu0 %1139  ;;  %1192 = vrot.lane.b32.xlu0 %v1101_v61, %s1953_s15 }
 0x70c   : > { %1202 = vrot.lane.b32.xlu1 %v1118_v53, %s1953_s15 }
 0x70e   : > { %v1124_v56 = vpop.permute.xlu1 %1123 }
 0x70f   : > { %v1122_v0 = vpop.permute.xlu0 %1121  ;;  %v1128_v5 = vsel %vm515_vm4, %v1124_v56, %v1126_v55 }
 0x710   : > { %1190 = vrot.lane.b32.xlu1 %v1103_v57, %s1953_s15  ;;  %1206 = vrot.lane.b32.xlu0 %v1122_v0, %s1953_s15  ;;  %v1127_v12 = vsel %vm515_vm4, %v1122_v0, %v1124_v56 }
 0x712   : > { %v1132_v62 = vpop.permute.xlu1 %1131 }
 0x713   : > { %v1134_v3 = vpop.permute.xlu0 %1133 }
 0x714   : > { %1188 = vrot.lane.b32.xlu1 %v1102_v63, %s1953_s15  ;;  %1196 = vrot.lane.b32.xlu0 %v1113_v58, %s1953_s15  ;;  %v1137_v13 = vsel %vm528_vm3, %v1132_v62, %v1134_v3  ;;  %v1138_v19 = vsel %vm528_vm3, %v1134_v3, %v1136_v51 }
 0x716   : > { %v1142_v59 = vpop.permute.xlu1 %1141 }
 0x717   : > { %v1144_v60 = vpop.permute.xlu0 %1143  ;;  %v1145_v10 = vsel %vm539_vm15, %v1140_v52, %v1142_v59 }
 0x718   : > { %1212 = vrot.lane.b32.xlu1 %v1132_v62, %s1953_s15  ;;  %1194 = vrot.lane.b32.xlu0 %v1112_v2, %s1953_s15  ;;  %v1146_v20 = vsel %vm539_vm15, %v1142_v59, %v1144_v60  ;;  %vm1581_vm15 = vcmask 31744  }
 0x71a   : > { %v1150_v6 = vpop.permute.xlu1 %1149 }
 0x71b   : > { %v1152_v7 = vpop.permute.xlu0 %1151 }
 0x71c   : > { %1210 = vrot.lane.b32.xlu1 %v1128_v5, %s1953_s15  ;;  %1220 = vrot.lane.b32.xlu0 %v1145_v10, %s1953_s15  ;;  %v1153_v25 = vsel %vm550_vm5, %v1150_v6, %v1152_v7  ;;  %v1154_v26 = vsel %vm550_vm5, %v1152_v7, %v2222_v8 }
 0x71e   : > { %v1177_v11 = vpop.permute.xlu1 %1176 }
 0x71f   : > { %v1181_v15 = vpop.permute.xlu0 %1180 }
 0x720   : > { %1208 = vrot.lane.b32.xlu0 %v1127_v12, %s1953_s15  ;;  %1214 = vrot.lane.b32.xlu1 %v1137_v13, %s1953_s15 }
 0x722   : > { %v1179_v16 = vpop.permute.xlu1 %1178 }
 0x723   : > { %v1230_v21 = vsel %vm452_vm2, %v1177_v11, %v1179_v16  ;;  %v1231_v22 = vsel %vm452_vm2, %v1179_v16, %v1181_v15 }
 0x724   : > { %1216 = vrot.lane.b32.xlu0 %v1138_v19, %s1953_s15  ;;  %1222 = vrot.lane.b32.xlu1 %v1146_v20, %s1953_s15 }
 0x725   : > { %1269 = vmatprep.subr.bf16.mxu0 %v1231_v22 }
 0x726   : > { %1270 = vmatpush1.bf16.msra.mxu0 %v1230_v21 }
 0x728   : > { %1218 = vrot.lane.b32.xlu0 %v1140_v52, %s1953_s15  ;;  %1226 = vrot.lane.b32.xlu1 %v1153_v25, %s1953_s15 }
 0x72c   : > { %1228 = vrot.lane.b32.xlu0 %v1154_v26, %s1953_s15  ;;  %1224 = vrot.lane.b32.xlu1 %v1150_v6, %s1953_s15  ;;  %v1882_v6 = vld [vmem:[%s2462_s5] ss:$8 sps:$4 sm:$0xff]  }
 0x730   : > { %1158 = vperm.xlu0 %1866, %v2216_v4   ;;  %1162 = vperm.xlu1 %1867, %v2231_v9  }
 0x734   : > { %1869 = vset.pattern.permute.xlu1 %v1948_v1  ;;  %1868 = vset.pattern.permute.xlu0 %v1948_v1 }
 0x76e   : > { %v1187_v27 = vpop.permute.xlu1 %1186 }
 0x771   : > { %v1205_v30 = vpop.permute.xlu0 %1204 }
 0x772   : > { %v1201_v33 = vpop.permute.xlu1 %1200 }
 0x775   : > { %v1185_v32 = vpop.permute.xlu0 %1184 }
 0x776   : > { %v1233_v28 = vsel %vm452_vm2, %v1185_v32, %v1187_v27 }
 0x777   : > { %1271 = vmatprep.subr.bf16.mxu0 %v1233_v28 }
 0x779   : > { %v1183_v8 = vpop.permute.xlu0 %1182 }
 0x77a   : > { %v1199_v31 = vpop.permute.xlu1 %1198  ;;  %v1232_v29 = vsel %vm452_vm2, %v1183_v8, %v1185_v32 }
 0x77b   : > { %1272 = vmatpush1.bf16.msra.mxu0 %v1232_v29 }
 0x77d   : > { %v1193_v37 = vpop.permute.xlu0 %1192 }
 0x77e   : > { %v1203_v34 = vpop.permute.xlu1 %1202 }
 0x77f   : > { %v1239_v42 = vsel %vm452_vm2, %v1203_v34, %v1205_v30  ;;  %v1238_v45 = vsel %vm452_vm2, %v1201_v33, %v1203_v34 }
 0x782   : > { %v1191_v40 = vpop.permute.xlu1 %1190  ;;  %v1207_v43 = vpop.permute.xlu0 %1206 }
 0x783   : > { %v1235_v44 = vsel %vm452_vm2, %v1191_v40, %v1193_v37 }
 0x784   : > { %1273 = vmatprep.subr.bf16.mxu0 %v1235_v44 }
 0x786   : > { %v1189_v50 = vpop.permute.xlu1 %1188  ;;  %v1197_v35 = vpop.permute.xlu0 %1196 }
 0x787   : > { %v1234_v36 = vsel %vm452_vm2, %v1189_v50, %v1191_v40  ;;  %v1237_v55 = vsel %vm452_vm2, %v1197_v35, %v1199_v31 }
 0x788   : > { %1274 = vmatpush1.bf16.msra.mxu0 %v1234_v36 }
 0x789   : > { %1275 = vmatprep.subr.bf16.mxu0 %v1237_v55 }
 0x78a   : > { %v1213_v38 = vpop.permute.xlu1 %1212  ;;  %v1195_v39 = vpop.permute.xlu0 %1194 }
 0x78b   : > { %v1236_v41 = vsel %vm452_vm2, %v1195_v39, %v1197_v35  ;;  %v1883_v39 = vld [vmem:[%s2464_s7] sm:$0xff]  }
 0x78c   : > { %1276 = vmatpush1.bf16.msra.mxu0 %v1236_v41  ;;  %v1967_v41 = vmov 4  }
 0x78d   : > { %1277 = vmatprep.subr.bf16.mxu0 %v1239_v42 }
 0x78e   : > { %v1211_v61 = vpop.permute.xlu1 %1210  ;;  %v1221_v24 = vpop.permute.xlu0 %1220 }
 0x790   : > { %1278 = vmatpush1.bf16.msra.mxu0 %v1238_v45 }
 0x792   : > { %v1215_v46 = vpop.permute.xlu1 %1214  ;;  %v1209_v47 = vpop.permute.xlu0 %1208 }
 0x793   : > { %v1240_v48 = vsel %vm452_vm2, %v1207_v43, %v1209_v47  ;;  %v1241_v51 = vsel %vm452_vm2, %v1209_v47, %v1211_v61  ;;  %v1242_v57 = vsel %vm452_vm2, %v1213_v38, %v1215_v46  ;;  %v1586_v38 = vsel %vm2484_vm10, %v2041_v17, 0 }
 0x794   : > { %1279 = vmatprep.subr.bf16.mxu0 %v1241_v51  ;;  %v1968_v17 = vmov 5  }
 0x795   : > { %1280 = vmatpush1.bf16.msra.mxu0 %v1240_v48 }
 0x796   : > { %v1223_v52 = vpop.permute.xlu1 %1222  ;;  %v1217_v53 = vpop.permute.xlu0 %1216 }
 0x797   : > { %v1243_v56 = vsel %vm452_vm2, %v1215_v46, %v1217_v53  ;;  %v1245_v0 = vsel %vm452_vm2, %v1221_v24, %v1223_v52 }
 0x798   : > { %1281 = vmatprep.subr.bf16.mxu0 %v1243_v56 }
 0x799   : > { %1282 = vmatpush1.bf16.msra.mxu0 %v1242_v57 }
 0x79a   : > { %v1227_v62 = vpop.permute.xlu1 %1226  ;;  %1283 = vmatprep.subr.bf16.mxu0 %v1245_v0  ;;  %v1219_v63 = vpop.permute.xlu0 %1218 }
 0x79b   : > { %v1244_v3 = vsel %vm452_vm2, %v1219_v63, %v1221_v24 }
 0x79d   : > { %1284 = vmatpush1.bf16.msra.mxu0 %v1244_v3 }
 0x79e   : > { %v1225_v58 = vpop.permute.xlu1 %1224  ;;  %v1229_v59 = vpop.permute.xlu0 %1228 }
 0x79f   : > { %v1246_v60 = vsel %vm452_vm2, %v1225_v58, %v1227_v62  ;;  %v1247_v2 = vsel %vm452_vm2, %v1227_v62, %v1229_v59 }
 0x7a0   : > { %1285 = vmatprep.subr.bf16.mxu0 %v1247_v2 }
 0x7a1   : > { %1286 = vmatpush1.bf16.msra.mxu0 %v1246_v60 }
 0x7a4   : > { %1302 = vmatmul.mubr.bf16.vlgmr.msra.gmra.mrb[4].mxu0 %v1882_v6 }
 0x7af   : > { %v1159_v5 = vpop.permute.xlu0 %1158  ;;  %v1163_v7 = vpop.permute.xlu1 %1162 }
 0x877   : > { %v1303_v10 = vpop.f32.mrb[4].mxu0 }
 0x878   : > { %v1304_v11 = vadd.f32 %v1303_v10, %v1159_v5  ;;  %v1305_v12 = vpop.f32.mrb[5].mxu0 }
 0x879   : > { %v1306_v13 = vadd.f32 %v1305_v12, %v1159_v5  ;;  %v1307_v14 = vpop.f32.mrb[6].mxu0 }
 0x87a   : > { %v1308_v15 = vadd.f32 %v1307_v14, %v1163_v7  ;;  %v1309_v16 = vpop.f32.mrb[7].mxu0 }
 0x87b   : > { %v1312_v19 = vadd.f32 %v1306_v13, %v1304_v11  ;;  %v1310_v20 = vadd.f32 %v1309_v16, %v1163_v7 }
 0x87d   : > { %v1315_v21 = vadd.f32 %v1310_v20, %v1308_v15  ;;  %1313 = vadd.xlane.f32.xlu1 %v1312_v19 }
 0x87f   : > { %1316 = vadd.xlane.f32.xlu0 %v1315_v21 }
 0x90a   : > { %v1314_v22 = vpop.xlane.xlu1 %1313 }
 0x90c   : > { %v1317_v23 = vpop.xlane.xlu0 %1316 }
 0x90d   : > { %v1819_v25 = vpack.c.bf16 %v1317_v23, %v1314_v22 }
 0x90f   : > { %1820 = vmatprep.subr.bf16.mxu1 %v1819_v25 }
 0x910   : > { %1822 = vmatpush3.bf16.msra.mxu1 %v1819_v25 }
 0x913   : > { %1802 = vmatmul.mubr.msk.f32.vlgmr.msra.gmra.mrb[8].mxu1 %vm708_vm13, %v2255_v54 }
 0x914   : > { %1808 = vmatprep.mubr.msk.f32.mxu1 %vm708_vm13, %v2248_v49 }
 0x9e6   : > { %v1803_v26 = vpop.f32.mrb[8].mxu1 }
 0x9e7   : > { %v1394_v27 = vmul.f32 0.001953125, %v1803_v26  ;;  %v1384_v30 = vpop.f32.mrb[9].mxu1 }
 0x9e8   : > { %v1393_v32 = vmul.f32 0.001953125, %v1384_v30 }
 0x9e9   : > { %1402 = vperm.xlu1 %1869, %v1394_v27  }
 0x9ea   : > { %1397 = vperm.xlu0 %1868, %v1393_v32  }
 0x9ed   : > { %1871 = vset.pattern.permute.xlu1 %v1967_v41 }
 0x9ee   : > { %1870 = vset.pattern.permute.xlu0 %v1967_v41 }
 0xa68   : > { %v1403_v33 = vpop.permute.xlu1 %1402 }
 0xa69   : > { %v1407_v28 = vsub.f32 %v1308_v15, %v1403_v33  ;;  %v1408_v8 = vsub.f32 %v1310_v20, %v1403_v33  ;;  %v1398_v31 = vpop.permute.xlu0 %1397 }
 0xa6a   : > { %v1405_v29 = vsub.f32 %v1304_v11, %v1398_v31  ;;  %v1406_v37 = vsub.f32 %v1306_v13, %v1398_v31 }
 0xa6b   : > { %v1411_v34 = vmul.f32 %v1407_v28, %v1407_v28  ;;  %v1412_v40 = vmul.f32 %v1408_v8, %v1408_v8 }
 0xa6c   : > { %v1409_v43 = vmul.f32 %v1405_v29, %v1405_v29  ;;  %v1410_v44 = vmul.f32 %v1406_v37, %v1406_v37 }
 0xa6d   : > { %v1416_v50 = vadd.f32 %v1412_v40, %v1411_v34 }
 0xa6e   : > { %v1413_v35 = vadd.f32 %v1410_v44, %v1409_v43 }
 0xa6f   : > { %1417 = vadd.xlane.f32.xlu0 %v1416_v50 }
 0xa70   : > { %1414 = vadd.xlane.f32.xlu1 %v1413_v35 }
 0xa81   : > { %1519 = vperm.xlu1 %1871, %v2231_v9  }
 0xa85   : > { %1515 = vperm.xlu0 %1870, %v2216_v4   ;;  %1872 = vset.pattern.permute.xlu1 %v1968_v17 }
 0xa86   : > { %1527 = vperm.xlu1 %1872, %v2216_v4  }
 0xa8a   : > { %1873 = vset.pattern.permute.xlu1 %v1948_v1 }
 0xafc   : > { %v1418_v49 = vpop.xlane.xlu0 %1417 }
 0xafd   : > { %v1415_v36 = vpop.xlane.xlu1 %1414 }
 0xafe   : > { %v1823_v55 = vpack.c.bf16 %v1418_v49, %v1415_v36 }
 0xb00   : > { %1824 = vmatprep.subr.bf16.mxu1 %v1823_v55 }
 0xb01   : > { %1826 = vmatpush3.bf16.msra.mxu1 %v1823_v55  ;;  %v1520_v56 = vpop.permute.xlu1 %1519 }
 0xb02   : > { %1749 = vmatprep.subr.msk.bf16.mxu1 %vm2483_vm9, %v2044_v18  ;;  %v1969_v18 = vmov 7  }
 0xb03   : > { %1876 = vset.pattern.permute.xlu0 %v1969_v18 }
 0xb04   : > { %1809 = vmatmul.mubr.msk.f32.vlgmr.msra.gmra.mrb[10].mxu1 %vm708_vm13, %v2255_v54  ;;  %v1516_v58 = vpop.permute.xlu0 %1515 }
 0xb05   : > { %1592 = vmatpush1.bf16.msra.mxu1 %v1586_v38  ;;  %1623 = vmatprep.mubr.bf16.mxu1 %v1948_v1  ;;  %v1528_v57 = vpop.permute.xlu1 %1527 }
 0xb08   : > { %1750 = vmatmul.mubr.msk.bf16.vlgmr.msra.gmra.mrb[12].mxu1 %vm1581_vm15, %v1883_v39 }
 0xbd7   : > { %v1810_v54 = vpop.f32.mrb[10].mxu1 }
 0xbd8   : > { %v1495_v42 = vmul.f32 0.001953125, %v1810_v54  ;;  %v1485_v61 = vpop.f32.mrb[11].mxu1 }
 0xbd9   : > { %v1494_v24 = vmul.f32 0.001953125, %v1485_v61 }
 0xbda   : > { %v1497_v45 = vadd.f32 1e-05, %v1495_v42 }
 0xbdb   : > { %v1496_v46 = vadd.f32 1e-05, %v1494_v24  ;;  %v1625_v1 = vpop.f32.mrb[12].mxu1 }
 0xbdc   : > { %1920 = vrsqrt.f32 %v1497_v45  ;;  %v1627_v51 = vpop.f32.mrb[13].mxu1 }
 0xbdd   : > { %1922 = vrsqrt.f32 %v1496_v46  ;;  %v1629_v52 = vpop.f32.mrb[14].mxu1 }
 0xbde   : > { %v1631_v53 = vpop.f32.mrb[15].mxu1 }
 0xbe6   : > { %v1921_v47 = vpop.eup %1920 }
 0xbe7   : > { %1507 = vperm.xlu1 %1873, %v1921_v47   ;;  %v1923_v48 = vpop.eup %1922 }
 0xbeb   : > { %1502 = vperm.xlu1 %1873, %v1923_v48  }
 0xbef   : > { %1874 = vset.pattern.permute.xlu1 %v1968_v17 }
 0xbf0   : > { %1531 = vperm.xlu1 %1874, %v2231_v9  }
 0xbf4   : > { %1875 = vset.pattern.permute.xlu1 %v1969_v18 }
 0xbf5   : > { %1569 = vperm.xlu1 %1875, %v2216_v4  }
 0xbf9   : > { %1573 = vperm.xlu1 %1875, %v2231_v9  }
 0xc66   : > { %v1508_v0 = vpop.permute.xlu1 %1507 }
 0xc67   : > { %v1512_v62 = vmul.f32 %v1508_v0, %v1407_v28  ;;  %v1513_v63 = vmul.f32 %v1508_v0, %v1408_v8 }
 0xc69   : > { %v1524_v5 = vmul.f32 %v1520_v56, %v1512_v62  ;;  %v1525_v10 = vmul.f32 %v1520_v56, %v1513_v63 }
 0xc6a   : > { %v1503_v3 = vpop.permute.xlu1 %1502 }
 0xc6b   : > { %v1510_v59 = vmul.f32 %v1503_v3, %v1405_v29  ;;  %v1511_v60 = vmul.f32 %v1503_v3, %v1406_v37 }
 0xc6d   : > { %v1522_v2 = vmul.f32 %v1516_v58, %v1510_v59  ;;  %v1523_v6 = vmul.f32 %v1516_v58, %v1511_v60 }
 0xc6f   : > { %v1534_v4 = vadd.f32 %v1528_v57, %v1522_v2  ;;  %v1535_v7 = vadd.f32 %v1528_v57, %v1523_v6  ;;  %v1532_v9 = vpop.permute.xlu1 %1531 }
 0xc70   : > { %v1536_v11 = vadd.f32 %v1532_v9, %v1524_v5  ;;  %v1537_v12 = vadd.f32 %v1532_v9, %v1525_v10 }
 0xc71   : > { %v1744_v13 = vmul.f32 -1.442695, %v1534_v4  ;;  %v1745_v14 = vmul.f32 -1.442695, %v1535_v7 }
 0xc72   : > { %v1746_v15 = vmul.f32 -1.442695, %v1536_v11  ;;  %v1747_v16 = vmul.f32 -1.442695, %v1537_v12 }
 0xc73   : > { %1924 = vpow2.f32 %v1744_v13 }
 0xc74   : > { %1926 = vpow2.f32 %v1745_v14  ;;  %v1570_v30 = vpop.permute.xlu1 %1569 }
 0xc75   : > { %1928 = vpow2.f32 %v1746_v15  ;;  %v1626_v31 = vadd.f32 %v1625_v1, %v1570_v30  ;;  %v1628_v34 = vadd.f32 %v1627_v51, %v1570_v30 }
 0xc76   : > { %1930 = vpow2.f32 %v1747_v16 }
 0xc78   : > { %v1574_v33 = vpop.permute.xlu1 %1573 }
 0xc79   : > { %v1630_v50 = vadd.f32 %v1629_v52, %v1574_v33  ;;  %v1632_v36 = vadd.f32 %v1631_v53, %v1574_v33 }
 0xc7d   : > { %v1925_v19 = vpop.eup %1924 }
 0xc7e   : > { %v1927_v20 = vpop.eup %1926  ;;  %v1550_v21 = vadd.f32 1.0, %v1925_v19 }
 0xc7f   : > { %v1929_v22 = vpop.eup %1928  ;;  %v1551_v23 = vadd.f32 1.0, %v1927_v20 }
 0xc80   : > { %v1931_v25 = vpop.eup %1930  ;;  %1932 = vrcp.f32 %v1550_v21  ;;  %v1552_v26 = vadd.f32 1.0, %v1929_v22 }
 0xc81   : > { %1934 = vrcp.f32 %v1551_v23  ;;  %v1553_v27 = vadd.f32 1.0, %v1931_v25 }
 0xc82   : > { %1936 = vrcp.f32 %v1552_v26 }
 0xc83   : > { %1938 = vrcp.f32 %v1553_v27 }
 0xc8a   : > { %v1933_v32 = vpop.eup %1932 }
 0xc8b   : > { %v1935_v28 = vpop.eup %1934  ;;  %v1562_v8 = vmul.f32 %v1933_v32, %v1534_v4 }
 0xc8c   : > { %v1937_v29 = vpop.eup %1936  ;;  %v1563_v37 = vmul.f32 %v1935_v28, %v1535_v7 }
 0xc8d   : > { %v1939_v40 = vpop.eup %1938  ;;  %v1564_v43 = vmul.f32 %v1937_v29, %v1536_v11  ;;  %v1634_v44 = vadd.f32 %v1626_v31, %v1562_v8 }
 0xc8e   : > { %v1565_v35 = vmul.f32 %v1939_v40, %v1537_v12  ;;  %v1635_v49 = vadd.f32 %v1628_v34, %v1563_v37 }
 0xc8f   : > { %1638 = vst [vmem:[%s325_s22] sm:$0xff] %v1634_v44  ;;  %v1636_v55 = vadd.f32 %v1630_v50, %v1564_v43 }
 0xc90   : > { %1639 = vst [vmem:[%s325_s22 + $0x8] sm:$0xff] %v1635_v49  ;;  %v1637_v38 = vadd.f32 %v1632_v36, %v1565_v35 }
 0xc91   : > { %1640 = vst [vmem:[%s325_s22 + $0x10] sm:$0xff] %v1636_v55 }
 0xc92   : > { %1641 = vst [vmem:[%s325_s22 + $0x18] sm:$0xff] %v1637_v38 }
 0xc93 PF: > { %s18_s27 = sadd.s32 1, %s1946_s27  }
 0xc94   : > { %p15_p4 = scmp.ge.s32.totalorder %s18_s27, 4  }
 0xc96   :  { %17 = sbr.rel (!%p15_p4) target bundleno = 1 (0x1), region = 85 }

</bundles_post_ra>
